<compile_context>
chip_gen: v7x
topology: tpu7x:2x2x1
jax: 0.10.0
libtpu: 0.0.40
codegen_flags: <defaults>
</compile_context>

<pallas_src>
import functools

import jax
import jax.numpy as jnp
from jax import lax
from jax.experimental import pallas as pl
from jax.experimental.pallas import tpu as pltpu


# ----------------------------------------------------------------------------
# Pallas kernel (x flattened to (Cin, B_TILE*Lp); all branch matmuls are fat)
# ----------------------------------------------------------------------------
def _inception_kernel(x_ref,                      # (Cin, BL)      f32
                      wf_ref, bf_ref,             # (88, Cin) bf16, (88, 1) f32
                      w2_ref, b2_ref,             # (3, 64, 48) bf16, (64, 1) f32
                      w3_ref, b3_ref,             # (5, 16, 8) bf16,  (16, 1) f32
                      w4_ref, b4_ref,             # (16, Cin) bf16,   (16, 1) f32
                      o_ref,                      # (B_TILE, 128, Lp) f32
                      *, b_tile, l_pad, l_true, cdt):
    bl = b_tile * l_pad
    f32 = jnp.float32

    x = x_ref[...]                                           # (Cin, BL) f32

    # Position of each flattened lane within its sample; boundary masks are
    # computed once per grid step (hoisted — JAX does not CSE iota/broadcast).
    pos = lax.broadcasted_iota(jnp.int32, (1, bl), 1) % l_pad
    masks = {off: jnp.logical_and(pos + off >= 0, pos + off < l_true)
             for off in (-2, -1, 1, 2)}

    def tap(v, off, fill):
        """v[:, lane+off] if the source stays inside the same sample's first
        l_true positions, else `fill` (PyTorch zero / -inf 'same' padding)."""
        if off == 0:
            return v
        rolled = pltpu.roll(v, (-off) % bl, 1)               # XLU lane roll
        return jnp.where(masks[off], rolled, fill)

    def store(r0, r1, val):
        # Store-only unroll: `val` is fully live regardless, and both the
        # column slices (multiples of l_pad, itself a multiple of 128) and the
        # row offsets (multiples of 8) are vreg-aligned -> plain stores.
        for b in range(b_tile):
            o_ref[b, r0:r1, :] = val[:, b * l_pad:(b + 1) * l_pad]

    def mm(w_bf16, v):
        # bf16 MXU operands, f32 accumulation.
        return jnp.dot(w_bf16, v.astype(cdt), preferred_element_type=f32)

    relu = lambda v: jnp.maximum(v, 0.0)

    # ---- branches 1/2/3 share their 1x1 convs: one fused (88,Cin) matmul ----
    h = relu(mm(wf_ref[...], x) + bf_ref[...])               # (88, BL) f32
    store(0, 32, h[0:32])                                    # branch 1 output
    h2 = h[32:80]                                            # (48, BL)
    h3 = h[80:88]                                            # (8,  BL)

    # ---- branch 2: k=3 'same' conv as 3 accumulated per-tap matmuls --------
    acc2 = mm(w2_ref[1], h2)
    acc2 = acc2 + mm(w2_ref[0], tap(h2, -1, 0.0))
    acc2 = acc2 + mm(w2_ref[2], tap(h2, 1, 0.0))
    store(32, 96, relu(acc2 + b2_ref[...]))                  # (64, BL)

    # ---- branch 3: k=5 'same' conv as 5 accumulated per-tap matmuls --------
    acc3 = mm(w3_ref[2], h3)
    for k in (0, 1, 3, 4):
        acc3 = acc3 + mm(w3_ref[k], tap(h3, k - 2, 0.0))
    store(96, 112, relu(acc3 + b3_ref[...]))                 # (16, BL)

    # ---- branch 4: maxpool(k=3, s=1, pad=1, -inf pad) then 1x1 conv --------
    ninf = float("-inf")
    pooled = jnp.maximum(jnp.maximum(tap(x, -1, ninf), x), tap(x, 1, ninf))
    store(112, 128, relu(mm(w4_ref[...], pooled) + b4_ref[...]))


# ----------------------------------------------------------------------------
# Tile selection (generation-aware) and wrapper
# ----------------------------------------------------------------------------
def _round_up(a, m):
    return (a + m - 1) // m * m


def _vmem_capacity_bytes():
    try:
        return int(pltpu.get_tpu_info().vmem_capacity_bytes)
    except Exception:
        return 64 * 1024 * 1024          # conservative (v7x-sized) fallback


def _pick_b_tile(n, cin, l_pad, cap=64):
    """Largest batch tile whose per-step working set fits ~half of the VMEM
    limit we request, while keeping >=2 grid steps (v7x: 2 TensorCores)."""
    budget = _vmem_capacity_bytes() * 3 // 8
    # double-buffered in/out tiles + ~512 rows of live f32 intermediates
    per_col = 4 * (2 * cin + 2 * 128 + 512)
    cols = max(l_pad, budget // per_col)
    bt = max(1, min(cols // l_pad, cap))
    return min(bt, max(1, (n + 1) // 2))


def inception_block_1d(x_ncl, params, *, b_tile=None, compute_dtype=jnp.bfloat16):
    """x_ncl: (N, Cin, L) float32 -> (N, 128, L) float32 (PyTorch NCL layout)."""
    N, Cin, L = x_ncl.shape
    (w1, b1, w2a, b2a, w2b, b2b, w3a, b3a, w3b, b3b, w4, b4) = params
    f32, cdt = jnp.float32, compute_dtype

    # --- weight prep: fused 1x1, per-tap k=3/k=5, matmul operands in bf16 ---
    wf = jnp.concatenate([w1, w2a, w3a], axis=0).astype(cdt)             # (88, Cin)
    bf_ = jnp.concatenate([b1, b2a, b3a], axis=0)[:, None].astype(f32)   # (88, 1)
    w2 = jnp.transpose(w2b, (2, 0, 1)).astype(cdt)                       # (3, 64, 48)
    w3 = jnp.transpose(w3b, (2, 0, 1)).astype(cdt)                       # (5, 16, 8)
    w4c = w4.astype(cdt)                                                 # (16, Cin)
    b2_ = b2b[:, None].astype(f32)
    b3_ = b3b[:, None].astype(f32)
    b4_ = b4[:, None].astype(f32)
    weights = (wf, bf_, w2, b2_, w3, b3_, w4c, b4_)

    # --- pad L to a lane multiple and N to the batch tile; lane-flatten x ---
    Lp = _round_up(L, 128)
    if b_tile is None:
        b_tile = _pick_b_tile(N, Cin, Lp)
    n_pad = _round_up(N, b_tile)
    xp = jnp.pad(x_ncl, ((0, n_pad - N), (0, 0), (0, Lp - L)))
    x_flat = jnp.transpose(xp, (1, 0, 2)).reshape(Cin, n_pad * Lp)  # tiny input transpose

    bl = b_tile * Lp
    grid = (n_pad // b_tile,)
    kernel = functools.partial(_inception_kernel, b_tile=b_tile, l_pad=Lp,
                               l_true=L, cdt=cdt)

    def const_spec(a):
        # Weights are constant across grid steps (same block index every step).
        zeros = (0,) * a.ndim
        return pl.BlockSpec(a.shape, lambda n, _z=zeros: _z)

    flops = 2 * n_pad * Lp * (88 * Cin + 3 * 64 * 48 + 5 * 16 * 8 + 16 * Cin)
    bytes_accessed = (4 * (n_pad * Cin * Lp + n_pad * 128 * Lp)
                      + sum(int(a.size) * a.dtype.itemsize for a in weights))
    cost = pl.CostEstimate(flops=flops, transcendentals=0,
                           bytes_accessed=bytes_accessed)

    vmem_limit = min(_vmem_capacity_bytes() * 3 // 4, 128 * 1024 * 1024)

    out = pl.pallas_call(
        kernel,
        out_shape=jax.ShapeDtypeStruct((n_pad, 128, Lp), f32),
        grid_spec=pltpu.PrefetchScalarGridSpec(
            num_scalar_prefetch=0,
            grid=grid,
            in_specs=[pl.BlockSpec((Cin, bl), lambda n: (0, n))]
                     + [const_spec(a) for a in weights],
            out_specs=pl.BlockSpec((b_tile, 128, Lp), lambda n: (n, 0, 0)),
        ),
        compiler_params=pltpu.CompilerParams(
            dimension_semantics=("parallel",),          # batch tiles independent
            vmem_limit_bytes=vmem_limit,
        ),
        cost_estimate=cost,
    )(x_flat, *weights)

    return out[:N, :, :L]


# ----------------------------------------------------------------------------
# Deterministic parameter construction (PyTorch layout; synthetic values)
# ----------------------------------------------------------------------------
def make_params(in_c, key):
    """1x1 conv weights: (Cout, Cin); k>1 convs: (Cout, Cin, K); biases: (Cout,)."""
    ks = jax.random.split(key, 12)
    r = lambda k, s: jax.random.normal(k, s, jnp.float32) * 0.1
    w1 = r(ks[0], (32, in_c));   b1 = r(ks[1], (32,))
    w2a = r(ks[2], (48, in_c));  b2a = r(ks[3], (48,))
    w2b = r(ks[4], (64, 48, 3)); b2b = r(ks[5], (64,))
    w3a = r(ks[6], (8, in_c));   b3a = r(ks[7], (8,))
    w3b = r(ks[8], (16, 8, 5));  b3b = r(ks[9], (16,))
    w4 = r(ks[10], (16, in_c));  b4 = r(ks[11], (16,))
    return (w1, b1, w2a, b2a, w2b, b2b, w3a, b3a, w3b, b3b, w4, b4)


# ----------------------------------------------------------------------------
# Pure-JAX f32 reference (PyTorch semantics) for verification
# ----------------------------------------------------------------------------
def reference(x_ncl, params):
    (w1, b1, w2a, b2a, w2b, b2b, w3a, b3a, w3b, b3b, w4, b4) = params

    def conv(x, w_oik, b, pad):
        y = lax.conv_general_dilated(
            x, w_oik, window_strides=(1,), padding=[(pad, pad)],
            dimension_numbers=("NCH", "OIH", "NCH"))
        return y + b.reshape(1, -1, 1)

    relu = lambda v: jnp.maximum(v, 0.0)
    x1 = relu(conv(x_ncl, w1[:, :, None], b1, 0))
    x2 = relu(conv(relu(conv(x_ncl, w2a[:, :, None], b2a, 0)), w2b, b2b, 1))
    x3 = relu(conv(relu(conv(x_ncl, w3a[:, :, None], b3a, 0)), w3b, b3b, 2))
    pooled = lax.reduce_window(x_ncl, -jnp.inf, lax.max,
                               (1, 1, 3), (1, 1, 1), [(0, 0), (0, 0), (1, 1)])
    x4 = relu(conv(pooled, w4[:, :, None], b4, 0))
    return jnp.concatenate([x1, x2, x3, x4], axis=1)


if __name__ == "__main__":
    key = jax.random.PRNGKey(0)
    k_x, k_p = jax.random.split(key)

    # Small shapes; L=120 / N=3 exercise both the lane- and batch-padding paths.
    N, in_c, L = 3, 4, 120
    x = jax.random.normal(k_x, (N, in_c, L), jnp.float32)
    params = make_params(in_c, k_p)

    run = jax.jit(inception_block_1d)
    out = jax.block_until_ready(run(x, params))
    assert out.shape == (N, 128, L), out.shape

    ref = jax.block_until_ready(reference(x, params))
    err = float(jnp.max(jnp.abs(out - ref)))
    # bf16 matmul operands with f32 accumulation -> small numerical deltas.
    assert jnp.allclose(out, ref, rtol=2e-2, atol=2e-2), err

    print("KERNEL_OK")
</pallas_src>

<mosaic_0001>
module attributes {stable_mosaic.version = 11 : i64} {
  func.func @_inception_kernel(%arg0: i32, %arg1: memref<4x256xf32, #tpu.memory_space<vmem>>, %arg2: memref<88x4xbf16, #tpu.memory_space<vmem>>, %arg3: memref<88x1xf32, #tpu.memory_space<vmem>>, %arg4: memref<3x64x48xbf16, #tpu.memory_space<vmem>>, %arg5: memref<64x1xf32, #tpu.memory_space<vmem>>, %arg6: memref<5x16x8xbf16, #tpu.memory_space<vmem>>, %arg7: memref<16x1xf32, #tpu.memory_space<vmem>>, %arg8: memref<16x4xbf16, #tpu.memory_space<vmem>>, %arg9: memref<16x1xf32, #tpu.memory_space<vmem>>, %arg10: memref<2x128x128xf32, #tpu.memory_space<vmem>>) attributes {dimension_semantics = [#tpu.dimension_semantics<parallel>], iteration_bounds = array<i64: 2>, scalar_prefetch = 0 : i64, scratch_operands = 0 : i64, tpu.core_type = #tpu.core_type<tc>, window_params = [{transform_indices = @transform_0, window_bounds = array<i64: 4, 256>}, {pipeline_mode = #tpu.pipeline_mode<synchronous>, transform_indices = @transform_1, window_bounds = array<i64: 88, 4>}, {pipeline_mode = #tpu.pipeline_mode<synchronous>, transform_indices = @transform_2, window_bounds = array<i64: 88, 1>}, {pipeline_mode = #tpu.pipeline_mode<synchronous>, transform_indices = @transform_3, window_bounds = array<i64: 3, 64, 48>}, {pipeline_mode = #tpu.pipeline_mode<synchronous>, transform_indices = @transform_4, window_bounds = array<i64: 64, 1>}, {pipeline_mode = #tpu.pipeline_mode<synchronous>, transform_indices = @transform_5, window_bounds = array<i64: 5, 16, 8>}, {pipeline_mode = #tpu.pipeline_mode<synchronous>, transform_indices = @transform_6, window_bounds = array<i64: 16, 1>}, {pipeline_mode = #tpu.pipeline_mode<synchronous>, transform_indices = @transform_7, window_bounds = array<i64: 16, 4>}, {pipeline_mode = #tpu.pipeline_mode<synchronous>, transform_indices = @transform_8, window_bounds = array<i64: 16, 1>}, {transform_indices = @transform_9, window_bounds = array<i64: 2, 128, 128>}]} {
    %c0 = arith.constant 0 : index
    %c0_0 = arith.constant 0 : index
    %0 = vector.load %arg1[%c0, %c0_0] : memref<4x256xf32, #tpu.memory_space<vmem>>, vector<4x256xf32>
    %1 = tpu.iota {dimensions = array<i32: 1>} : vector<1x256xi32>
    %c128_i32 = arith.constant 128 : i32
    %c0_i32 = arith.constant 0 : i32
    %2 = arith.cmpi eq, %c128_i32, %c0_i32 : i32
    %c1_i32 = arith.constant 1 : i32
    %3 = arith.select %2, %c1_i32, %c128_i32 : i32
    %4 = vector.broadcast %3 : i32 to vector<1x256xi32>
    %5 = arith.remsi %1, %4 : vector<1x256xi32>
    %c0_i32_1 = arith.constant 0 : i32
    %6 = vector.broadcast %c0_i32_1 : i32 to vector<1x256xi32>
    %7 = arith.cmpi ne, %5, %6 : vector<1x256xi32>
    %c0_i32_2 = arith.constant 0 : i32
    %8 = vector.broadcast %c0_i32_2 : i32 to vector<1x256xi32>
    %9 = arith.cmpi slt, %5, %8 : vector<1x256xi32>
    %c0_i32_3 = arith.constant 0 : i32
    %10 = arith.cmpi slt, %3, %c0_i32_3 : i32
    %11 = vector.broadcast %10 : i1 to vector<1x256xi1>
    %12 = vector.broadcast %11 : vector<1x256xi1> to vector<1x256xi1>
    %13 = arith.xori %9, %12 : vector<1x256xi1>
    %14 = arith.andi %13, %7 : vector<1x256xi1>
    %15 = vector.broadcast %3 : i32 to vector<1x256xi32>
    %16 = arith.addi %5, %15 : vector<1x256xi32>
    %17 = arith.select %14, %16, %5 : vector<1x256xi1>, vector<1x256xi32>
    %c-2_i32 = arith.constant -2 : i32
    %18 = vector.broadcast %c-2_i32 : i32 to vector<1x256xi32>
    %19 = arith.addi %17, %18 : vector<1x256xi32>
    %c0_i32_4 = arith.constant 0 : i32
    %20 = vector.broadcast %c0_i32_4 : i32 to vector<1x256xi32>
    %21 = arith.cmpi sge, %19, %20 : vector<1x256xi32>
    %c-2_i32_5 = arith.constant -2 : i32
    %22 = vector.broadcast %c-2_i32_5 : i32 to vector<1x256xi32>
    %23 = arith.addi %17, %22 : vector<1x256xi32>
    %c120_i32 = arith.constant 120 : i32
    %24 = vector.broadcast %c120_i32 : i32 to vector<1x256xi32>
    %25 = arith.cmpi slt, %23, %24 : vector<1x256xi32>
    %26 = arith.andi %21, %25 : vector<1x256xi1>
    %c-1_i32 = arith.constant -1 : i32
    %27 = vector.broadcast %c-1_i32 : i32 to vector<1x256xi32>
    %28 = arith.addi %17, %27 : vector<1x256xi32>
    %c0_i32_6 = arith.constant 0 : i32
    %29 = vector.broadcast %c0_i32_6 : i32 to vector<1x256xi32>
    %30 = arith.cmpi sge, %28, %29 : vector<1x256xi32>
    %c-1_i32_7 = arith.constant -1 : i32
    %31 = vector.broadcast %c-1_i32_7 : i32 to vector<1x256xi32>
    %32 = arith.addi %17, %31 : vector<1x256xi32>
    %c120_i32_8 = arith.constant 120 : i32
    %33 = vector.broadcast %c120_i32_8 : i32 to vector<1x256xi32>
    %34 = arith.cmpi slt, %32, %33 : vector<1x256xi32>
    %35 = arith.andi %30, %34 : vector<1x256xi1>
    %c1_i32_9 = arith.constant 1 : i32
    %36 = vector.broadcast %c1_i32_9 : i32 to vector<1x256xi32>
    %37 = arith.addi %17, %36 : vector<1x256xi32>
    %c0_i32_10 = arith.constant 0 : i32
    %38 = vector.broadcast %c0_i32_10 : i32 to vector<1x256xi32>
    %39 = arith.cmpi sge, %37, %38 : vector<1x256xi32>
    %c1_i32_11 = arith.constant 1 : i32
    %40 = vector.broadcast %c1_i32_11 : i32 to vector<1x256xi32>
    %41 = arith.addi %17, %40 : vector<1x256xi32>
    %c120_i32_12 = arith.constant 120 : i32
    %42 = vector.broadcast %c120_i32_12 : i32 to vector<1x256xi32>
    %43 = arith.cmpi slt, %41, %42 : vector<1x256xi32>
    %44 = arith.andi %39, %43 : vector<1x256xi1>
    %c2_i32 = arith.constant 2 : i32
    %45 = vector.broadcast %c2_i32 : i32 to vector<1x256xi32>
    %46 = arith.addi %17, %45 : vector<1x256xi32>
    %c0_i32_13 = arith.constant 0 : i32
    %47 = vector.broadcast %c0_i32_13 : i32 to vector<1x256xi32>
    %48 = arith.cmpi sge, %46, %47 : vector<1x256xi32>
    %c2_i32_14 = arith.constant 2 : i32
    %49 = vector.broadcast %c2_i32_14 : i32 to vector<1x256xi32>
    %50 = arith.addi %17, %49 : vector<1x256xi32>
    %c120_i32_15 = arith.constant 120 : i32
    %51 = vector.broadcast %c120_i32_15 : i32 to vector<1x256xi32>
    %52 = arith.cmpi slt, %50, %51 : vector<1x256xi32>
    %53 = arith.andi %48, %52 : vector<1x256xi1>
    %c0_16 = arith.constant 0 : index
    %c0_17 = arith.constant 0 : index
    %54 = vector.load %arg2[%c0_16, %c0_17] : memref<88x4xbf16, #tpu.memory_space<vmem>>, vector<88x4xbf16>
    %55 = arith.truncf %0 : vector<4x256xf32> to vector<4x256xbf16>
    %cst = arith.constant dense<0.000000e+00> : vector<88x256xf32>
    %56 = tpu.matmul %54, %55, %cst {dimension_numbers = #tpu.dot_dimension_numbers<[1], [0], [0], [1], [0, 0, 1, 1], [], []>} : vector<88x4xbf16>, vector<4x256xbf16>, vector<88x256xf32> -> vector<88x256xf32>
    %c0_18 = arith.constant 0 : index
    %c0_19 = arith.constant 0 : index
    %57 = vector.load %arg3[%c0_18, %c0_19] : memref<88x1xf32, #tpu.memory_space<vmem>>, vector<88x1xf32>
    %58 = vector.broadcast %57 : vector<88x1xf32> to vector<88x256xf32>
    %59 = arith.addf %56, %58 : vector<88x256xf32>
    %cst_20 = arith.constant 0.000000e+00 : f32
    %60 = vector.broadcast %cst_20 : f32 to vector<88x256xf32>
    %61 = arith.maximumf %59, %60 : vector<88x256xf32>
    %62 = vector.extract_strided_slice %61 {offsets = [0, 0], sizes = [32, 256], strides = [1, 1]} : vector<88x256xf32> to vector<32x256xf32>
    %63 = vector.extract_strided_slice %62 {offsets = [0, 0], sizes = [32, 128], strides = [1, 1]} : vector<32x256xf32> to vector<32x128xf32>
    %c0_21 = arith.constant 0 : index
    %c0_22 = arith.constant 0 : index
    %c0_23 = arith.constant 0 : index
    %64 = vector.load %arg10[%c0_21, %c0_22, %c0_23] : memref<2x128x128xf32, #tpu.memory_space<vmem>>, vector<1x32x128xf32>
    %65 = vector.shape_cast %64 : vector<1x32x128xf32> to vector<32x128xf32>
    %66 = vector.shape_cast %63 : vector<32x128xf32> to vector<1x32x128xf32>
    tpu.vector_store %arg10[%c0_21, %c0_22, %c0_23], %66 {strides = array<i32>} : memref<2x128x128xf32, #tpu.memory_space<vmem>>, vector<1x32x128xf32>,
    %67 = vector.extract_strided_slice %62 {offsets = [0, 128], sizes = [32, 128], strides = [1, 1]} : vector<32x256xf32> to vector<32x128xf32>
    %c1 = arith.constant 1 : index
    %c0_24 = arith.constant 0 : index
    %c0_25 = arith.constant 0 : index
    %68 = vector.load %arg10[%c1, %c0_24, %c0_25] : memref<2x128x128xf32, #tpu.memory_space<vmem>>, vector<1x32x128xf32>
    %69 = vector.shape_cast %68 : vector<1x32x128xf32> to vector<32x128xf32>
    %70 = vector.shape_cast %67 : vector<32x128xf32> to vector<1x32x128xf32>
    tpu.vector_store %arg10[%c1, %c0_24, %c0_25], %70 {strides = array<i32>} : memref<2x128x128xf32, #tpu.memory_space<vmem>>, vector<1x32x128xf32>,
    %71 = vector.extract_strided_slice %61 {offsets = [32, 0], sizes = [48, 256], strides = [1, 1]} : vector<88x256xf32> to vector<48x256xf32>
    %72 = vector.extract_strided_slice %61 {offsets = [80, 0], sizes = [8, 256], strides = [1, 1]} : vector<88x256xf32> to vector<8x256xf32>
    %c1_26 = arith.constant 1 : index
    %c0_27 = arith.constant 0 : index
    %c0_28 = arith.constant 0 : index
    %73 = vector.load %arg4[%c1_26, %c0_27, %c0_28] : memref<3x64x48xbf16, #tpu.memory_space<vmem>>, vector<1x64x48xbf16>
    %74 = vector.shape_cast %73 : vector<1x64x48xbf16> to vector<64x48xbf16>
    %75 = arith.truncf %71 : vector<48x256xf32> to vector<48x256xbf16>
    %cst_29 = arith.constant dense<0.000000e+00> : vector<64x256xf32>
    %76 = tpu.matmul %74, %75, %cst_29 {dimension_numbers = #tpu.dot_dimension_numbers<[1], [0], [0], [1], [0, 0, 1, 1], [], []>} : vector<64x48xbf16>, vector<48x256xbf16>, vector<64x256xf32> -> vector<64x256xf32>
    %c0_30 = arith.constant 0 : index
    %c0_31 = arith.constant 0 : index
    %c0_32 = arith.constant 0 : index
    %77 = vector.load %arg4[%c0_30, %c0_31, %c0_32] : memref<3x64x48xbf16, #tpu.memory_space<vmem>>, vector<1x64x48xbf16>
    %78 = vector.shape_cast %77 : vector<1x64x48xbf16> to vector<64x48xbf16>
    %c1_i32_33 = arith.constant 1 : i32
    %79 = tpu.dynamic_rotate %71 by %c1_i32_33 dim 1 : vector<48x256xf32>, i32 -> vector<48x256xf32>
    %cst_34 = arith.constant 0.000000e+00 : f32
    %80 = vector.shape_cast %35 : vector<1x256xi1> to vector<1x256xi1>
    %81 = vector.broadcast %80 : vector<1x256xi1> to vector<48x256xi1>
    %82 = vector.broadcast %cst_34 : f32 to vector<48x256xf32>
    %83 = arith.select %81, %79, %82 : vector<48x256xi1>, vector<48x256xf32>
    %84 = arith.truncf %83 : vector<48x256xf32> to vector<48x256xbf16>
    %cst_35 = arith.constant dense<0.000000e+00> : vector<64x256xf32>
    %85 = tpu.matmul %78, %84, %cst_35 {dimension_numbers = #tpu.dot_dimension_numbers<[1], [0], [0], [1], [0, 0, 1, 1], [], []>} : vector<64x48xbf16>, vector<48x256xbf16>, vector<64x256xf32> -> vector<64x256xf32>
    %86 = arith.addf %76, %85 : vector<64x256xf32>
    %c2 = arith.constant 2 : index
    %c0_36 = arith.constant 0 : index
    %c0_37 = arith.constant 0 : index
    %87 = vector.load %arg4[%c2, %c0_36, %c0_37] : memref<3x64x48xbf16, #tpu.memory_space<vmem>>, vector<1x64x48xbf16>
    %88 = vector.shape_cast %87 : vector<1x64x48xbf16> to vector<64x48xbf16>
    %c255_i32 = arith.constant 255 : i32
    %89 = tpu.dynamic_rotate %71 by %c255_i32 dim 1 : vector<48x256xf32>, i32 -> vector<48x256xf32>
    %cst_38 = arith.constant 0.000000e+00 : f32
    %90 = vector.shape_cast %44 : vector<1x256xi1> to vector<1x256xi1>
    %91 = vector.broadcast %90 : vector<1x256xi1> to vector<48x256xi1>
    %92 = vector.broadcast %cst_38 : f32 to vector<48x256xf32>
    %93 = arith.select %91, %89, %92 : vector<48x256xi1>, vector<48x256xf32>
    %94 = arith.truncf %93 : vector<48x256xf32> to vector<48x256xbf16>
    %cst_39 = arith.constant dense<0.000000e+00> : vector<64x256xf32>
    %95 = tpu.matmul %88, %94, %cst_39 {dimension_numbers = #tpu.dot_dimension_numbers<[1], [0], [0], [1], [0, 0, 1, 1], [], []>} : vector<64x48xbf16>, vector<48x256xbf16>, vector<64x256xf32> -> vector<64x256xf32>
    %96 = arith.addf %86, %95 : vector<64x256xf32>
    %c0_40 = arith.constant 0 : index
    %c0_41 = arith.constant 0 : index
    %97 = vector.load %arg5[%c0_40, %c0_41] : memref<64x1xf32, #tpu.memory_space<vmem>>, vector<64x1xf32>
    %98 = vector.broadcast %97 : vector<64x1xf32> to vector<64x256xf32>
    %99 = arith.addf %96, %98 : vector<64x256xf32>
    %cst_42 = arith.constant 0.000000e+00 : f32
    %100 = vector.broadcast %cst_42 : f32 to vector<64x256xf32>
    %101 = arith.maximumf %99, %100 : vector<64x256xf32>
    %102 = vector.extract_strided_slice %101 {offsets = [0, 0], sizes = [64, 128], strides = [1, 1]} : vector<64x256xf32> to vector<64x128xf32>
    %c0_43 = arith.constant 0 : index
    %c32 = arith.constant 32 : index
    %c0_44 = arith.constant 0 : index
    %103 = vector.load %arg10[%c0_43, %c32, %c0_44] : memref<2x128x128xf32, #tpu.memory_space<vmem>>, vector<1x64x128xf32>
    %104 = vector.shape_cast %103 : vector<1x64x128xf32> to vector<64x128xf32>
    %105 = vector.shape_cast %102 : vector<64x128xf32> to vector<1x64x128xf32>
    tpu.vector_store %arg10[%c0_43, %c32, %c0_44], %105 {strides = array<i32>} : memref<2x128x128xf32, #tpu.memory_space<vmem>>, vector<1x64x128xf32>,
    %106 = vector.extract_strided_slice %101 {offsets = [0, 128], sizes = [64, 128], strides = [1, 1]} : vector<64x256xf32> to vector<64x128xf32>
    %c1_45 = arith.constant 1 : index
    %c32_46 = arith.constant 32 : index
    %c0_47 = arith.constant 0 : index
    %107 = vector.load %arg10[%c1_45, %c32_46, %c0_47] : memref<2x128x128xf32, #tpu.memory_space<vmem>>, vector<1x64x128xf32>
    %108 = vector.shape_cast %107 : vector<1x64x128xf32> to vector<64x128xf32>
    %109 = vector.shape_cast %106 : vector<64x128xf32> to vector<1x64x128xf32>
    tpu.vector_store %arg10[%c1_45, %c32_46, %c0_47], %109 {strides = array<i32>} : memref<2x128x128xf32, #tpu.memory_space<vmem>>, vector<1x64x128xf32>,
    %c2_48 = arith.constant 2 : index
    %c0_49 = arith.constant 0 : index
    %c0_50 = arith.constant 0 : index
    %110 = vector.load %arg6[%c2_48, %c0_49, %c0_50] : memref<5x16x8xbf16, #tpu.memory_space<vmem>>, vector<1x16x8xbf16>
    %111 = vector.shape_cast %110 : vector<1x16x8xbf16> to vector<16x8xbf16>
    %112 = arith.truncf %72 : vector<8x256xf32> to vector<8x256xbf16>
    %cst_51 = arith.constant dense<0.000000e+00> : vector<16x256xf32>
    %113 = tpu.matmul %111, %112, %cst_51 {dimension_numbers = #tpu.dot_dimension_numbers<[1], [0], [0], [1], [0, 0, 1, 1], [], []>} : vector<16x8xbf16>, vector<8x256xbf16>, vector<16x256xf32> -> vector<16x256xf32>
    %c0_52 = arith.constant 0 : index
    %c0_53 = arith.constant 0 : index
    %c0_54 = arith.constant 0 : index
    %114 = vector.load %arg6[%c0_52, %c0_53, %c0_54] : memref<5x16x8xbf16, #tpu.memory_space<vmem>>, vector<1x16x8xbf16>
    %115 = vector.shape_cast %114 : vector<1x16x8xbf16> to vector<16x8xbf16>
    %c2_i32_55 = arith.constant 2 : i32
    %116 = tpu.dynamic_rotate %72 by %c2_i32_55 dim 1 : vector<8x256xf32>, i32 -> vector<8x256xf32>
    %cst_56 = arith.constant 0.000000e+00 : f32
    %117 = vector.shape_cast %26 : vector<1x256xi1> to vector<1x256xi1>
    %118 = vector.broadcast %117 : vector<1x256xi1> to vector<8x256xi1>
    %119 = vector.broadcast %cst_56 : f32 to vector<8x256xf32>
    %120 = arith.select %118, %116, %119 : vector<8x256xi1>, vector<8x256xf32>
    %121 = arith.truncf %120 : vector<8x256xf32> to vector<8x256xbf16>
    %cst_57 = arith.constant dense<0.000000e+00> : vector<16x256xf32>
    %122 = tpu.matmul %115, %121, %cst_57 {dimension_numbers = #tpu.dot_dimension_numbers<[1], [0], [0], [1], [0, 0, 1, 1], [], []>} : vector<16x8xbf16>, vector<8x256xbf16>, vector<16x256xf32> -> vector<16x256xf32>
    %123 = arith.addf %113, %122 : vector<16x256xf32>
    %c1_58 = arith.constant 1 : index
    %c0_59 = arith.constant 0 : index
    %c0_60 = arith.constant 0 : index
    %124 = vector.load %arg6[%c1_58, %c0_59, %c0_60] : memref<5x16x8xbf16, #tpu.memory_space<vmem>>, vector<1x16x8xbf16>
    %125 = vector.shape_cast %124 : vector<1x16x8xbf16> to vector<16x8xbf16>
    %c1_i32_61 = arith.constant 1 : i32
    %126 = tpu.dynamic_rotate %72 by %c1_i32_61 dim 1 : vector<8x256xf32>, i32 -> vector<8x256xf32>
    %cst_62 = arith.constant 0.000000e+00 : f32
    %127 = vector.shape_cast %35 : vector<1x256xi1> to vector<1x256xi1>
    %128 = vector.broadcast %127 : vector<1x256xi1> to vector<8x256xi1>
    %129 = vector.broadcast %cst_62 : f32 to vector<8x256xf32>
    %130 = arith.select %128, %126, %129 : vector<8x256xi1>, vector<8x256xf32>
    %131 = arith.truncf %130 : vector<8x256xf32> to vector<8x256xbf16>
    %cst_63 = arith.constant dense<0.000000e+00> : vector<16x256xf32>
    %132 = tpu.matmul %125, %131, %cst_63 {dimension_numbers = #tpu.dot_dimension_numbers<[1], [0], [0], [1], [0, 0, 1, 1], [], []>} : vector<16x8xbf16>, vector<8x256xbf16>, vector<16x256xf32> -> vector<16x256xf32>
    %133 = arith.addf %123, %132 : vector<16x256xf32>
    %c3 = arith.constant 3 : index
    %c0_64 = arith.constant 0 : index
    %c0_65 = arith.constant 0 : index
    %134 = vector.load %arg6[%c3, %c0_64, %c0_65] : memref<5x16x8xbf16, #tpu.memory_space<vmem>>, vector<1x16x8xbf16>
    %135 = vector.shape_cast %134 : vector<1x16x8xbf16> to vector<16x8xbf16>
    %c255_i32_66 = arith.constant 255 : i32
    %136 = tpu.dynamic_rotate %72 by %c255_i32_66 dim 1 : vector<8x256xf32>, i32 -> vector<8x256xf32>
    %cst_67 = arith.constant 0.000000e+00 : f32
    %137 = vector.shape_cast %44 : vector<1x256xi1> to vector<1x256xi1>
    %138 = vector.broadcast %137 : vector<1x256xi1> to vector<8x256xi1>
    %139 = vector.broadcast %cst_67 : f32 to vector<8x256xf32>
    %140 = arith.select %138, %136, %139 : vector<8x256xi1>, vector<8x256xf32>
    %141 = arith.truncf %140 : vector<8x256xf32> to vector<8x256xbf16>
    %cst_68 = arith.constant dense<0.000000e+00> : vector<16x256xf32>
    %142 = tpu.matmul %135, %141, %cst_68 {dimension_numbers = #tpu.dot_dimension_numbers<[1], [0], [0], [1], [0, 0, 1, 1], [], []>} : vector<16x8xbf16>, vector<8x256xbf16>, vector<16x256xf32> -> vector<16x256xf32>
    %143 = arith.addf %133, %142 : vector<16x256xf32>
    %c4 = arith.constant 4 : index
    %c0_69 = arith.constant 0 : index
    %c0_70 = arith.constant 0 : index
    %144 = vector.load %arg6[%c4, %c0_69, %c0_70] : memref<5x16x8xbf16, #tpu.memory_space<vmem>>, vector<1x16x8xbf16>
    %145 = vector.shape_cast %144 : vector<1x16x8xbf16> to vector<16x8xbf16>
    %c254_i32 = arith.constant 254 : i32
    %146 = tpu.dynamic_rotate %72 by %c254_i32 dim 1 : vector<8x256xf32>, i32 -> vector<8x256xf32>
    %cst_71 = arith.constant 0.000000e+00 : f32
    %147 = vector.shape_cast %53 : vector<1x256xi1> to vector<1x256xi1>
    %148 = vector.broadcast %147 : vector<1x256xi1> to vector<8x256xi1>
    %149 = vector.broadcast %cst_71 : f32 to vector<8x256xf32>
    %150 = arith.select %148, %146, %149 : vector<8x256xi1>, vector<8x256xf32>
    %151 = arith.truncf %150 : vector<8x256xf32> to vector<8x256xbf16>
    %cst_72 = arith.constant dense<0.000000e+00> : vector<16x256xf32>
    %152 = tpu.matmul %145, %151, %cst_72 {dimension_numbers = #tpu.dot_dimension_numbers<[1], [0], [0], [1], [0, 0, 1, 1], [], []>} : vector<16x8xbf16>, vector<8x256xbf16>, vector<16x256xf32> -> vector<16x256xf32>
    %153 = arith.addf %143, %152 : vector<16x256xf32>
    %c0_73 = arith.constant 0 : index
    %c0_74 = arith.constant 0 : index
    %154 = vector.load %arg7[%c0_73, %c0_74] : memref<16x1xf32, #tpu.memory_space<vmem>>, vector<16x1xf32>
    %155 = vector.broadcast %154 : vector<16x1xf32> to vector<16x256xf32>
    %156 = arith.addf %153, %155 : vector<16x256xf32>
    %cst_75 = arith.constant 0.000000e+00 : f32
    %157 = vector.broadcast %cst_75 : f32 to vector<16x256xf32>
    %158 = arith.maximumf %156, %157 : vector<16x256xf32>
    %159 = vector.extract_strided_slice %158 {offsets = [0, 0], sizes = [16, 128], strides = [1, 1]} : vector<16x256xf32> to vector<16x128xf32>
    %c0_76 = arith.constant 0 : index
    %c96 = arith.constant 96 : index
    %c0_77 = arith.constant 0 : index
    %160 = vector.load %arg10[%c0_76, %c96, %c0_77] : memref<2x128x128xf32, #tpu.memory_space<vmem>>, vector<1x16x128xf32>
    %161 = vector.shape_cast %160 : vector<1x16x128xf32> to vector<16x128xf32>
    %162 = vector.shape_cast %159 : vector<16x128xf32> to vector<1x16x128xf32>
    tpu.vector_store %arg10[%c0_76, %c96, %c0_77], %162 {strides = array<i32>} : memref<2x128x128xf32, #tpu.memory_space<vmem>>, vector<1x16x128xf32>,
    %163 = vector.extract_strided_slice %158 {offsets = [0, 128], sizes = [16, 128], strides = [1, 1]} : vector<16x256xf32> to vector<16x128xf32>
    %c1_78 = arith.constant 1 : index
    %c96_79 = arith.constant 96 : index
    %c0_80 = arith.constant 0 : index
    %164 = vector.load %arg10[%c1_78, %c96_79, %c0_80] : memref<2x128x128xf32, #tpu.memory_space<vmem>>, vector<1x16x128xf32>
    %165 = vector.shape_cast %164 : vector<1x16x128xf32> to vector<16x128xf32>
    %166 = vector.shape_cast %163 : vector<16x128xf32> to vector<1x16x128xf32>
    tpu.vector_store %arg10[%c1_78, %c96_79, %c0_80], %166 {strides = array<i32>} : memref<2x128x128xf32, #tpu.memory_space<vmem>>, vector<1x16x128xf32>,
    %c1_i32_81 = arith.constant 1 : i32
    %167 = tpu.dynamic_rotate %0 by %c1_i32_81 dim 1 : vector<4x256xf32>, i32 -> vector<4x256xf32>
    %cst_82 = arith.constant 0xFF800000 : f32
    %168 = vector.shape_cast %35 : vector<1x256xi1> to vector<1x256xi1>
    %169 = vector.broadcast %168 : vector<1x256xi1> to vector<4x256xi1>
    %170 = vector.broadcast %cst_82 : f32 to vector<4x256xf32>
    %171 = arith.select %169, %167, %170 : vector<4x256xi1>, vector<4x256xf32>
    %172 = arith.maximumf %171, %0 : vector<4x256xf32>
    %c255_i32_83 = arith.constant 255 : i32
    %173 = tpu.dynamic_rotate %0 by %c255_i32_83 dim 1 : vector<4x256xf32>, i32 -> vector<4x256xf32>
    %cst_84 = arith.constant 0xFF800000 : f32
    %174 = vector.shape_cast %44 : vector<1x256xi1> to vector<1x256xi1>
    %175 = vector.broadcast %174 : vector<1x256xi1> to vector<4x256xi1>
    %176 = vector.broadcast %cst_84 : f32 to vector<4x256xf32>
    %177 = arith.select %175, %173, %176 : vector<4x256xi1>, vector<4x256xf32>
    %178 = arith.maximumf %172, %177 : vector<4x256xf32>
    %c0_85 = arith.constant 0 : index
    %c0_86 = arith.constant 0 : index
    %179 = vector.load %arg8[%c0_85, %c0_86] : memref<16x4xbf16, #tpu.memory_space<vmem>>, vector<16x4xbf16>
    %180 = arith.truncf %178 : vector<4x256xf32> to vector<4x256xbf16>
    %cst_87 = arith.constant dense<0.000000e+00> : vector<16x256xf32>
    %181 = tpu.matmul %179, %180, %cst_87 {dimension_numbers = #tpu.dot_dimension_numbers<[1], [0], [0], [1], [0, 0, 1, 1], [], []>} : vector<16x4xbf16>, vector<4x256xbf16>, vector<16x256xf32> -> vector<16x256xf32>
    %c0_88 = arith.constant 0 : index
    %c0_89 = arith.constant 0 : index
    %182 = vector.load %arg9[%c0_88, %c0_89] : memref<16x1xf32, #tpu.memory_space<vmem>>, vector<16x1xf32>
    %183 = vector.broadcast %182 : vector<16x1xf32> to vector<16x256xf32>
    %184 = arith.addf %181, %183 : vector<16x256xf32>
    %cst_90 = arith.constant 0.000000e+00 : f32
    %185 = vector.broadcast %cst_90 : f32 to vector<16x256xf32>
    %186 = arith.maximumf %184, %185 : vector<16x256xf32>
    %187 = vector.extract_strided_slice %186 {offsets = [0, 0], sizes = [16, 128], strides = [1, 1]} : vector<16x256xf32> to vector<16x128xf32>
    %c0_91 = arith.constant 0 : index
    %c112 = arith.constant 112 : index
    %c0_92 = arith.constant 0 : index
    %188 = vector.load %arg10[%c0_91, %c112, %c0_92] : memref<2x128x128xf32, #tpu.memory_space<vmem>>, vector<1x16x128xf32>
    %189 = vector.shape_cast %188 : vector<1x16x128xf32> to vector<16x128xf32>
    %190 = vector.shape_cast %187 : vector<16x128xf32> to vector<1x16x128xf32>
    tpu.vector_store %arg10[%c0_91, %c112, %c0_92], %190 {strides = array<i32>} : memref<2x128x128xf32, #tpu.memory_space<vmem>>, vector<1x16x128xf32>,
    %191 = vector.extract_strided_slice %186 {offsets = [0, 128], sizes = [16, 128], strides = [1, 1]} : vector<16x256xf32> to vector<16x128xf32>
    %c1_93 = arith.constant 1 : index
    %c112_94 = arith.constant 112 : index
    %c0_95 = arith.constant 0 : index
    %192 = vector.load %arg10[%c1_93, %c112_94, %c0_95] : memref<2x128x128xf32, #tpu.memory_space<vmem>>, vector<1x16x128xf32>
    %193 = vector.shape_cast %192 : vector<1x16x128xf32> to vector<16x128xf32>
    %194 = vector.shape_cast %191 : vector<16x128xf32> to vector<1x16x128xf32>
    tpu.vector_store %arg10[%c1_93, %c112_94, %c0_95], %194 {strides = array<i32>} : memref<2x128x128xf32, #tpu.memory_space<vmem>>, vector<1x16x128xf32>,
    return
  }
  func.func @transform_0(%arg0: i32) -> (i32, i32) {
    %c0_i32 = arith.constant 0 : i32
    %c0_i32_0 = arith.constant 0 : i32
    return %c0_i32, %arg0 : i32, i32
  }
  func.func @transform_1(%arg0: i32) -> (i32, i32) {
    %c0_i32 = arith.constant 0 : i32
    %c0_i32_0 = arith.constant 0 : i32
    %c0_i32_1 = arith.constant 0 : i32
    return %c0_i32, %c0_i32_0 : i32, i32
  }
  func.func @transform_2(%arg0: i32) -> (i32, i32) {
    %c0_i32 = arith.constant 0 : i32
    %c0_i32_0 = arith.constant 0 : i32
    %c0_i32_1 = arith.constant 0 : i32
    return %c0_i32, %c0_i32_0 : i32, i32
  }
  func.func @transform_3(%arg0: i32) -> (i32, i32, i32) {
    %c0_i32 = arith.constant 0 : i32
    %c0_i32_0 = arith.constant 0 : i32
    %c0_i32_1 = arith.constant 0 : i32
    %c0_i32_2 = arith.constant 0 : i32
    return %c0_i32, %c0_i32_0, %c0_i32_1 : i32, i32, i32
  }
  func.func @transform_4(%arg0: i32) -> (i32, i32) {
    %c0_i32 = arith.constant 0 : i32
    %c0_i32_0 = arith.constant 0 : i32
    %c0_i32_1 = arith.constant 0 : i32
    return %c0_i32, %c0_i32_0 : i32, i32
  }
  func.func @transform_5(%arg0: i32) -> (i32, i32, i32) {
    %c0_i32 = arith.constant 0 : i32
    %c0_i32_0 = arith.constant 0 : i32
    %c0_i32_1 = arith.constant 0 : i32
    %c0_i32_2 = arith.constant 0 : i32
    return %c0_i32, %c0_i32_0, %c0_i32_1 : i32, i32, i32
  }
  func.func @transform_6(%arg0: i32) -> (i32, i32) {
    %c0_i32 = arith.constant 0 : i32
    %c0_i32_0 = arith.constant 0 : i32
    %c0_i32_1 = arith.constant 0 : i32
    return %c0_i32, %c0_i32_0 : i32, i32
  }
  func.func @transform_7(%arg0: i32) -> (i32, i32) {
    %c0_i32 = arith.constant 0 : i32
    %c0_i32_0 = arith.constant 0 : i32
    %c0_i32_1 = arith.constant 0 : i32
    return %c0_i32, %c0_i32_0 : i32, i32
  }
  func.func @transform_8(%arg0: i32) -> (i32, i32) {
    %c0_i32 = arith.constant 0 : i32
    %c0_i32_0 = arith.constant 0 : i32
    %c0_i32_1 = arith.constant 0 : i32
    return %c0_i32, %c0_i32_0 : i32, i32
  }
  func.func @transform_9(%arg0: i32) -> (i32, i32, i32) {
    %c0_i32 = arith.constant 0 : i32
    %c0_i32_0 = arith.constant 0 : i32
    %c0_i32_1 = arith.constant 0 : i32
    return %arg0, %c0_i32, %c0_i32_0 : i32, i32, i32
  }
}

</mosaic_0001>

<bundles_post_ra>
// kernel: inception_block_1d.1
= control target key start
LH: loop header
LB: loop body
LE: loop exit
PB: predicated region body
PF: predicated region fallthrough
CT: control target
= control target key end

     0   :  { %s2168_s30 = smov 0   ;;  %s2747_s0 = inlined_call_operand.vmem [shape: f32[4,512], index: 0, kind: input, shape index: {}]   ;;  %s2748_s1 = inlined_call_operand.vmem [shape: bf16[88,4], index: 1, kind: input, shape index: {}]   ;;  %s2749_s2 = inlined_call_operand.vmem [shape: f32[88,1], index: 2, kind: input, shape index: {}]   ;;  %s2750_s3 = inlined_call_operand.vmem [shape: bf16[3,64,48], index: 3, kind: input, shape index: {}]   ;;  %s2751_s4 = inlined_call_operand.vmem [shape: f32[64,1], index: 4, kind: input, shape index: {}]   ;;  %s2752_s5 = inlined_call_operand.vmem [shape: bf16[5,16,8], index: 5, kind: input, shape index: {}]   ;;  %s2753_s6 = inlined_call_operand.vmem [shape: f32[16,1], index: 6, kind: input, shape index: {}]   ;;  %s2754_s7 = inlined_call_operand.vmem [shape: bf16[16,4], index: 7, kind: input, shape index: {}]   ;;  %s2755_s8 = inlined_call_operand.vmem [shape: f32[16,1], index: 8, kind: input, shape index: {}]   ;;  %s2756_s9 = inlined_call_operand.vmem [shape: f32[4,128,128], index: 9, kind: output, shape index: {}]  }
   0x1 LB: > { %s1783_s10 = sadd.s32 4294967295, %s2111_s30   ;;  %p1787_p0 = scmp.ge.s32.totalorder %s2111_s30, 1  ;;  %s2111_s30 = sphi %s2168_s30, %s19_s30  }
   0x2   : > { %p288_p1 = scmp.lt.s32.totalorder %s2111_s30, 3 }
   0x4   : > { %p289_p2 = pnand %p1787_p0, %p288_p1 }
   0x5   : > { %s1788_s11 = sshll.u32 (!%p289_p2), %s1783_s10, 1  ;;  %v2113_v0 = vmov (!%p289_p2), 0   ;;  %v419_v1 = vld [vmem:[%s2749_s2 + $0x20] sm:$0xff] (!%p289_p2)  ;;  %vm528_vm0 = vcmask (!%p289_p2), 1041408   ;;  %v420_v3 = vld [vmem:[%s2749_s2 + $0x28] sm:$0xff] (!%p289_p2)  ;;  %v421_v4 = vld [vmem:[%s2749_s2 + $0x30] sm:$0xff] (!%p289_p2) }
   0x6   : > { %292 = sbr.rel (%p289_p2) target bundleno = 710 (0x2c6), region = 56  ;;  %p326_p3 = scmp.lt.s32.totalorder (!%p289_p2), %s1788_s11, 3  ;;  %567 = vmatprep.mubr.bf16.mxu0 (!%p289_p2), %v2113_v0  ;;  %1988 = vset.pattern.permute.xlu0 (!%p289_p2), %v2113_v0  ;;  %vm509_vm1 = vcmask (!%p289_p2), 31744   ;;  %v422_v7 = vld [vmem:[%s2749_s2 + $0x38] sm:$0xff] (!%p289_p2)  ;;  %v2081_v10 = vld [vmem:[%s2748_s1] sm:$0xff] (!%p289_p2)   ;;  %v424_v12 = vld [vmem:[%s2749_s2 + $0x48] sm:$0xff] (!%p289_p2) }
   0x7   : > { %1989 = vset.pattern.permute.xlu1 (!%p289_p2), %v2113_v0  ;;  %804 = vmatprep.mubr.bf16.mxu1 (!%p289_p2), %v2113_v0  ;;  %v423_v11 = vld [vmem:[%s2749_s2 + $0x40] sm:$0xff] (!%p289_p2)  ;;  %v425_v13 = vld [vmem:[%s2749_s2 + $0x50] sm:$0xff] (!%p289_p2)  ;;  %v2082_v14 = vld [vmem:[%s2748_s1 + $0x8] sm:$0xff] (!%p289_p2)   ;;  %s2114_s23 = smov (!%p289_p2), 1   ;;  %s2115_s24 = smov (!%p289_p2), 2  }
   0x8   : > { %448 = vperm.xlu0 (!%p289_p2), %1988, %v419_v1   ;;  %458 = vperm.xlu1 (!%p289_p2), %1989, %v421_v4   ;;  %v2083_v15 = vld [vmem:[%s2748_s1 + $0x10] sm:$0xff] (!%p289_p2)   ;;  %v2084_v16 = vld [vmem:[%s2748_s1 + $0x18] sm:$0xff] (!%p289_p2)   ;;  %v2085_v17 = vld [vmem:[%s2748_s1 + $0x20] sm:$0xff] (!%p289_p2)   ;;  %s2116_s25 = smov (!%p289_p2), 127   ;;  %s2117_s26 = smov (!%p289_p2), 126  }
   0x9   : > { %v2086_v18 = vld [vmem:[%s2748_s1 + $0x28] ss:$0 sps:$4 sm:$0xff] (!%p289_p2)  }
   0xc   : > { %453 = vperm.xlu0 (!%p289_p2), %1988, %v420_v3   ;;  %463 = vperm.xlu1 (!%p289_p2), %1989, %v422_v7  }
   0xd   : > { %s2770_s11 = smov (!%p326_p3, %s1788_s11), 3 }
   0xe   : > { %s1789_s12 = sshll.u32 %s2770_s11, 2  ;;  %s1926_s18 = sshll.u32 %s2770_s11, 7 }
   0xf   : > { %s329_s17 = scalar_lea.vmem %s2747_s0, %s1789_s12  ;;  %s2609_s20 = scalar_lea.vmem %s2756_s9, %s1926_s18 }
  0x10   : > { %v2189_v2 = vld [vmem:[%s329_s17] sm:$0xff]  ;;  %468 = vperm.xlu0 %1988, %v423_v11   ;;  %473 = vperm.xlu1 %1989, %v424_v12  }
  0x11   : > { %v2199_v5 = vcombine.high %v2189_v2, %v2189_v2  ;;  %v413_v6 = vpack.c.bf16 %v2189_v2, %v2189_v2 }
  0x13   : > { %v414_v8 = vpack.c.bf16 %v2199_v5, %v2199_v5  ;;  %v530_v9 = vsel %vm528_vm0, %v413_v6, 0 }
  0x14   : > { %478 = vperm.xlu0 %1988, %v425_v13  }
  0x15   : > { %1799 = vmatprep.subr.msk.bf16.mxu0 %vm528_vm0, %v414_v8 }
  0x16   : > { %536 = vmatpush1.bf16.msra.mxu0 %v530_v9 }
  0x19   : > { %1800 = vmatmul.mubr.msk.bf16.vlgmr.msra.gmra.mrb[0].mxu0 %vm509_vm1, %v2081_v10 }
  0x1a   : > { %577 = vmatprep.mubr.bf16.mxu0 %v2113_v0 }
  0x21   : > { %1801 = vmatmul.mubr.msk.bf16.gmra.mrb[4].mxu0 %vm509_vm1, %v2082_v14 }
  0x22   : > { %587 = vmatprep.mubr.bf16.mxu0 %v2113_v0 }
  0x29   : > { %1802 = vmatmul.mubr.msk.bf16.gmra.mrb[8].mxu0 %vm509_vm1, %v2083_v15 }
  0x2a   : > { %597 = vmatprep.mubr.bf16.mxu0 %v2113_v0 }
  0x31   : > { %1803 = vmatmul.mubr.msk.bf16.gmra.mrb[12].mxu0 %vm509_vm1, %v2084_v16 }
  0x32   : > { %607 = vmatprep.mubr.bf16.mxu0 %v2113_v0 }
  0x39   : > { %1804 = vmatmul.mubr.msk.bf16.gmra.mrb[16].mxu0 %vm509_vm1, %v2085_v17 }
  0x3a   : > { %617 = vmatprep.mubr.bf16.mxu0 %v2113_v0 }
  0x41   : > { %1805 = vmatmul.mubr.msk.bf16.gmra.mrb[20].mxu0 %vm509_vm1, %v2086_v18 }
  0x42   : > { %1305 = vmatprep.mubr.bf16.mxu0 %v2113_v0 }
  0x87   : > { %v449_v27 = vpop.permute.xlu0 %448  ;;  %v459_v37 = vpop.permute.xlu1 %458 }
  0x8b   : > { %v454_v31 = vpop.permute.xlu0 %453  ;;  %v464_v49 = vpop.permute.xlu1 %463 }
  0x8f   : > { %v469_v61 = vpop.permute.xlu0 %468  ;;  %v474_v6 = vpop.permute.xlu1 %473 }
  0x93   : > { %v479_v18 = vpop.permute.xlu0 %478 }
  0xec   : > { %v2249_v19 = vpop.f32.mrb[0].mxu0 }
  0xed   : > { %v2251_v20 = vpop.f32.mrb[1].mxu0 }
  0xee   : > { %v2253_v21 = vpop.f32.mrb[2].mxu0 }
  0xef   : > { %v2255_v22 = vpop.f32.mrb[3].mxu0 }
  0xf4   : > { %v2257_v23 = vpop.f32.mrb[4].mxu0 }
  0xf5   : > { %v2259_v24 = vpop.f32.mrb[5].mxu0 }
  0xf6   : > { %v2261_v25 = vpop.f32.mrb[6].mxu0 }
  0xf7   : > { %v2263_v26 = vpop.f32.mrb[7].mxu0 }
  0xfc   : > { %v589_v28 = vpop.f32.mrb[8].mxu0 }
  0xfd   : > { %v590_v29 = vadd.f32 %v589_v28, %v449_v27  ;;  %v591_v30 = vpop.f32.mrb[9].mxu0 }
  0xfe   : > { %v592_v32 = vadd.f32 %v591_v30, %v449_v27  ;;  %v593_v33 = vpop.f32.mrb[10].mxu0 }
  0xff   : > { %v594_v34 = vadd.f32 %v593_v33, %v454_v31  ;;  %v595_v35 = vpop.f32.mrb[11].mxu0  ;;  %v634_v38 = vmax.f32 %v590_v29, 0.0 }
 0x100   : > { %v596_v36 = vadd.f32 %v595_v35, %v454_v31  ;;  %v635_v40 = vmax.f32 %v592_v32, 0.0 }
 0x101   : > { %v636_v39 = vmax.f32 %v594_v34, 0.0 }
 0x102   : > { %v637_v41 = vmax.f32 %v596_v36, 0.0 }
 0x103   : > { %v2265_v42 = vpack.c.bf16 %v636_v39, %v634_v38  ;;  %v1990_v43 = vpack.i.bf16 %v636_v39, %v634_v38  ;;  %v2075_v38 = vpack.i.bf16 %v2199_v5, %v2189_v2  ;;  %v416_v39 = vld [vmem:[%s2749_s2 + $0x8] sm:$0xff] }
 0x104   : > { %v599_v44 = vpop.f32.mrb[12].mxu0  ;;  %v1995_v45 = vpack.i.bf16 %v637_v41, %v635_v40  ;;  %v2267_v46 = vpack.c.bf16 %v637_v41, %v635_v40  ;;  %v415_v40 = vld [vmem:[%s2749_s2] sm:$0xff]  ;;  %v418_v41 = vld [vmem:[%s2749_s2 + $0x18] sm:$0xff] }
 0x105   : > { %v600_v47 = vadd.f32 %v599_v44, %v459_v37  ;;  %v601_v48 = vpop.f32.mrb[13].mxu0  ;;  %1991 = vrot.lane.b32.xlu1 %v1990_v43, %s2114_s23  ;;  %v1140_v44 = vld [vmem:[%s2751_s4 + $0x8] sm:$0xff] }
 0x106   : > { %v602_v50 = vadd.f32 %v601_v48, %v459_v37  ;;  %v603_v51 = vpop.f32.mrb[14].mxu0  ;;  %1996 = vrot.lane.b32.xlu0 %v1995_v45, %s2114_s23  ;;  %v1141_v48 = vld [vmem:[%s2751_s4 + $0x10] sm:$0xff] }
 0x107   : > { %v604_v52 = vadd.f32 %v603_v51, %v464_v49  ;;  %v605_v53 = vpop.f32.mrb[15].mxu0  ;;  %v638_v55 = vmax.f32 %v600_v47, 0.0  ;;  %v1142_v47 = vld [vmem:[%s2751_s4 + $0x18] sm:$0xff] }
 0x108   : > { %v606_v54 = vadd.f32 %v605_v53, %v464_v49  ;;  %v639_v57 = vmax.f32 %v602_v50, 0.0  ;;  %v1144_v49 = vld [vmem:[%s2751_s4 + $0x28] sm:$0xff]  ;;  %v1143_v50 = vld [vmem:[%s2751_s4 + $0x20] sm:$0xff]  ;;  %v1146_v51 = vld [vmem:[%s2751_s4 + $0x38] sm:$0xff] }
 0x109   : > { %v640_v56 = vmax.f32 %v604_v52, 0.0  ;;  %v1145_v52 = vld [vmem:[%s2751_s4 + $0x30] sm:$0xff]  ;;  %v1601_v53 = vld [vmem:[%s2753_s6 + $0x8] sm:$0xff] }
 0x10a   : > { %v641_v58 = vmax.f32 %v606_v54, 0.0  ;;  %v1600_v54 = vld [vmem:[%s2753_s6] sm:$0xff] }
 0x10b   : > { %v2271_v59 = vpack.c.bf16 %v640_v56, %v638_v55  ;;  %v2000_v60 = vpack.i.bf16 %v640_v56, %v638_v55  ;;  %v1649_v55 = vld [vmem:[%s2755_s8 + $0x8] sm:$0xff]  ;;  %v1648_v56 = vld [vmem:[%s2755_s8] sm:$0xff] }
 0x10c   : > { %v609_v62 = vpop.f32.mrb[16].mxu0  ;;  %v2005_v63 = vpack.i.bf16 %v641_v58, %v639_v57  ;;  %v2273_v1 = vpack.c.bf16 %v641_v58, %v639_v57  ;;  %v340_v57 = vlaneseq }
 0x10d   : > { %v610_v3 = vadd.f32 %v609_v62, %v469_v61  ;;  %v611_v4 = vpop.f32.mrb[17].mxu0  ;;  %2001 = vrot.lane.b32.xlu1 %v2000_v60, %s2114_s23 }
 0x10e   : > { %v612_v7 = vadd.f32 %v611_v4, %v469_v61  ;;  %v613_v8 = vpop.f32.mrb[18].mxu0  ;;  %2006 = vrot.lane.b32.xlu0 %v2005_v63, %s2114_s23  ;;  %v2341_v58 = vand.u32 127, %v340_v57 }
 0x10f   : > { %v614_v9 = vadd.f32 %v613_v8, %v474_v6  ;;  %v615_v10 = vpop.f32.mrb[19].mxu0  ;;  %v642_v12 = vmax.f32 %v610_v3, 0.0 }
 0x110   : > { %v616_v11 = vadd.f32 %v615_v10, %v474_v6  ;;  %v643_v14 = vmax.f32 %v612_v7, 0.0  ;;  %vm704_vm7 = vcmp.lt.s32.totalorder %v2341_v58, 1 }
 0x111   : > { %v644_v13 = vmax.f32 %v614_v9, 0.0 }
 0x112   : > { %v645_v15 = vmax.f32 %v616_v11, 0.0 }
 0x113   : > { %v2277_v16 = vpack.c.bf16 %v644_v13, %v642_v12  ;;  %v2010_v17 = vpack.i.bf16 %v644_v13, %v642_v12 }
 0x114   : > { %v619_v27 = vpop.f32.mrb[20].mxu0  ;;  %v2015_v28 = vpack.i.bf16 %v645_v15, %v643_v14  ;;  %v2279_v29 = vpack.c.bf16 %v645_v15, %v643_v14 }
 0x115   : > { %v620_v30 = vadd.f32 %v619_v27, %v479_v18  ;;  %v621_v31 = vpop.f32.mrb[21].mxu0  ;;  %2011 = vrot.lane.b32.xlu1 %v2010_v17, %s2114_s23 }
 0x116   : > { %v622_v32 = vadd.f32 %v621_v31, %v479_v18  ;;  %v623_v33 = vpop.f32.mrb[22].mxu0  ;;  %2016 = vrot.lane.b32.xlu0 %v2015_v28, %s2114_s23 }
 0x117   : > { %v2283_v34 = vmax.f32 %v620_v30, 0.0  ;;  %v624_v35 = vpop.f32.mrb[23].mxu0 }
 0x118   : > { %v2285_v36 = vmax.f32 %v622_v32, 0.0 }
 0x11a   : > { %v2030_v37 = vpack.i.bf16 %v2285_v36, %v2283_v34 }
 0x11c   : > { %2031 = vrot.lane.b32.xlu0 %v2030_v37, %s2114_s23  ;;  %2021 = vrot.lane.b32.xlu1 %v2030_v37, %s2115_s24 }
 0x120   : > { %2036 = vrot.lane.b32.xlu0 %v1995_v45, %s2116_s25  ;;  %2026 = vrot.lane.b32.xlu1 %v1990_v43, %s2116_s25  ;;  %v417_v43 = vld [vmem:[%s2749_s2 + $0x10] sm:$0xff]  ;;  %v1139_v45 = vld [vmem:[%s2751_s4] sm:$0xff] }
 0x124   : > { %2046 = vrot.lane.b32.xlu0 %v2005_v63, %s2116_s25  ;;  %2041 = vrot.lane.b32.xlu1 %v2000_v60, %s2116_s25  ;;  %v342_v60 = vadd.s32 128, %v2341_v58  ;;  %v375_v63 = vadd.s32 4294967295, %v2341_v58 }
 0x126   : > { %v2344_v61 = vand.u32 127, %v342_v60  ;;  %vm377_vm4 = vcmp.ge.s32.totalorder %v375_v63, 0  ;;  %vm379_vm5 = vcmp.lt.s32.totalorder %v375_v63, 120 }
 0x127   : > { %vm2353_vm8 = vmand %vm377_vm4, %vm379_vm5  ;;  %vm983_vm5 = vcmp.lt.s32.totalorder %v2341_v58, 127 }
 0x128   : > { %2056 = vrot.lane.b32.xlu0 %v2015_v28, %s2116_s25  ;;  %2051 = vrot.lane.b32.xlu1 %v2010_v17, %s2116_s25  ;;  %v376_v62 = vadd.s32 4294967295, %v2344_v61  ;;  %vm2375_vm10 = vmpackc.low %vm2353_vm8, %vm2353_vm8 }
 0x12a   : > { %vm378_vm2 = vcmp.ge.s32.totalorder %v376_v62, 0  ;;  %vm380_vm3 = vcmp.lt.s32.totalorder %v376_v62, 120 }
 0x12b   : > { %vm2348_vm6 = vmand %vm378_vm2, %vm380_vm3  ;;  %vm1246_vm2 = vcmp.lt.s32.totalorder %v2341_v58, 2  ;;  %vm759_vm3 = vcmask 392192  }
 0x12c   : > { %2066 = vrot.lane.b32.xlu0 %v2030_v37, %s2117_s26  ;;  %2061 = vrot.lane.b32.xlu1 %v2030_v37, %s2116_s25  ;;  %vm2364_vm9 = vmpackc.low %vm2348_vm6, %vm2348_vm6 }
 0x130   : > { %2076 = vrot.lane.b32.xlu0 %v2075_v38, %s2116_s25  ;;  %2071 = vrot.lane.b32.xlu1 %v2075_v38, %s2114_s23 }
 0x134   : > { %433 = vperm.xlu0 %1988, %v416_v39   ;;  %428 = vperm.xlu1 %1989, %v415_v40  }
 0x138   : > { %443 = vperm.xlu0 %1988, %v418_v41   ;;  %438 = vperm.xlu1 %1989, %v417_v43  }
 0x13c   : > { %1154 = vperm.xlu0 %1988, %v1140_v44   ;;  %1149 = vperm.xlu1 %1989, %v1139_v45   ;;  %v368_v45 = vadd.s32 4294967294, %v2344_v61 }
 0x13e   : > { %vm370_vm11 = vcmp.ge.s32.totalorder %v368_v45, 0  ;;  %vm372_vm12 = vcmp.lt.s32.totalorder %v368_v45, 120 }
 0x13f   : > { %vm374_vm15 = vmand %vm370_vm11, %vm372_vm12  ;;  %vm1262_vm11 = vcmask 64512  }
 0x140   : > { %1164 = vperm.xlu0 %1988, %v1142_v47   ;;  %1159 = vperm.xlu1 %1989, %v1141_v48  }
 0x144   : > { %1174 = vperm.xlu0 %1988, %v1144_v49   ;;  %1169 = vperm.xlu1 %1989, %v1143_v50  }
 0x148   : > { %1184 = vperm.xlu0 %1988, %v1146_v51   ;;  %1179 = vperm.xlu1 %1989, %v1145_v52   ;;  %v367_v51 = vadd.s32 4294967294, %v2341_v58 }
 0x14a   : > { %vm369_vm13 = vcmp.ge.s32.totalorder %v367_v51, 0  ;;  %vm371_vm14 = vcmp.lt.s32.totalorder %v367_v51, 120 }
 0x14b   : > { %vm373_vm4 = vmand %vm369_vm13, %vm371_vm14  ;;  %vm1528_vm13 = vcmp.lt.s32.totalorder %v2341_v58, 126 }
 0x14c   : > { %1609 = vperm.xlu0 %1988, %v1601_v53   ;;  %1604 = vperm.xlu1 %1989, %v1600_v54  }
 0x150   : > { %1657 = vperm.xlu0 %1988, %v1649_v55   ;;  %1652 = vperm.xlu1 %1989, %v1648_v56  }
 0x177   : > { %v1992_v3 = vpop.permute.xlu1 %1991 }
 0x178   : > { %v1994_v4 = vunpack.i.h.bf16 %v1992_v3  ;;  %v1993_v6 = vunpack.i.l.bf16 %v1992_v3  ;;  %v1997_v7 = vpop.permute.xlu0 %1996 }
 0x179   : > { %v1999_v9 = vunpack.i.h.bf16 %v1997_v7  ;;  %v1998_v10 = vunpack.i.l.bf16 %v1997_v7 }
 0x17b   : > { %v705_v12 = vsel %vm704_vm7, %v1993_v6, %v1998_v10  ;;  %v706_v13 = vsel %vm704_vm7, %v1994_v4, %v1999_v9  ;;  %v711_v15 = vsel %vm704_vm7, %v1998_v10, %v1993_v6  ;;  %v712_v17 = vsel %vm704_vm7, %v1999_v9, %v1994_v4  ;;  %v2087_v4 = vld [vmem:[%s2750_s3] sm:$0xff]  }
 0x17c   : > { %v1823_v18 = vpack.c.bf16 %v706_v13, %v705_v12  ;;  %v1826_v28 = vpack.c.bf16 %v712_v17, %v711_v15 }
 0x17e   : > { %1824 = vmatprep.subr.msk.bf16.mxu1 %vm2364_vm9, %v1823_v18 }
 0x17f   : > { %v2002_v30 = vpop.permute.xlu1 %2001  ;;  %1827 = vmatpush1.bf16.msk.msra.mxu1 %vm2375_vm10, %v1826_v28  ;;  %v2420_v28 = vadd.s32 1, %v2344_v61 }
 0x180   : > { %v2004_v31 = vunpack.i.h.bf16 %v2002_v30  ;;  %v2003_v32 = vunpack.i.l.bf16 %v2002_v30  ;;  %v2007_v33 = vpop.permute.xlu0 %2006 }
 0x181   : > { %v2009_v35 = vunpack.i.h.bf16 %v2007_v33  ;;  %v2008_v37 = vunpack.i.l.bf16 %v2007_v33 }
 0x183   : > { %v707_v38 = vsel %vm704_vm7, %v2003_v32, %v2008_v37  ;;  %v708_v39 = vsel %vm704_vm7, %v2004_v31, %v2009_v35  ;;  %v713_v40 = vsel %vm704_vm7, %v2008_v37, %v2003_v32  ;;  %v714_v41 = vsel %vm704_vm7, %v2009_v35, %v2004_v31 }
 0x184   : > { %v1829_v43 = vpack.c.bf16 %v708_v39, %v707_v38  ;;  %v1832_v44 = vpack.c.bf16 %v714_v41, %v713_v40  ;;  %v2088_v39 = vld [vmem:[%s2752_s5] sm:$0xff]   ;;  %v1238_v40 = vpack.c.bf16 %v2283_v34, %v2283_v34 }
 0x186   : > { %1830 = vmatprep.subr.msk.bf16.mxu1 %vm2364_vm9, %v1829_v43 }
 0x187   : > { %v2012_v47 = vpop.permute.xlu1 %2011  ;;  %1833 = vmatpush1.bf16.msk.msra.mxu1 %vm2375_vm10, %v1832_v44 }
 0x188   : > { %v2014_v48 = vunpack.i.h.bf16 %v2012_v47  ;;  %v2013_v49 = vunpack.i.l.bf16 %v2012_v47  ;;  %v2017_v50 = vpop.permute.xlu0 %2016 }
 0x189   : > { %v2019_v52 = vunpack.i.h.bf16 %v2017_v50  ;;  %v2018_v53 = vunpack.i.l.bf16 %v2017_v50  ;;  %v2090_v50 = vld [vmem:[%s2750_s3 + $0x10] sm:$0xff]  }
 0x18b   : > { %v709_v54 = vsel %vm704_vm7, %v2013_v49, %v2018_v53  ;;  %v710_v55 = vsel %vm704_vm7, %v2014_v48, %v2019_v52  ;;  %v715_v56 = vsel %vm704_vm7, %v2018_v53, %v2013_v49  ;;  %v716_v57 = vsel %vm704_vm7, %v2019_v52, %v2014_v48 }
 0x18c   : > { %v1835_v60 = vpack.c.bf16 %v710_v55, %v709_v54  ;;  %v1838_v62 = vpack.c.bf16 %v716_v57, %v715_v56  ;;  %v2091_v56 = vld [vmem:[%s2752_s5 + $0x10] sm:$0xff]  }
 0x18e   : > { %v2032_v63 = vpop.permute.xlu0 %2031  ;;  %v2022_v3 = vpop.permute.xlu1 %2021  ;;  %1836 = vmatprep.subr.msk.bf16.mxu1 %vm2364_vm9, %v1835_v60  ;;  %vm1266_vm9 = vcmask 1043456  }
 0x18f   : > { %v2024_v6 = vunpack.i.h.bf16 %v2022_v3  ;;  %v2023_v7 = vunpack.i.l.bf16 %v2022_v3  ;;  %1839 = vmatpush1.bf16.msk.msra.mxu1 %vm2375_vm10, %v1838_v62  ;;  %v2034_v9 = vunpack.i.h.bf16 %v2032_v63  ;;  %v2033_v10 = vunpack.i.l.bf16 %v2032_v63 }
 0x190   : > { %877 = vmatprep.subr.bf16.mxu1 %v2267_v46  ;;  %vm388_vm10 = vcmp.lt.s32.totalorder %v2420_v28, 120  ;;  %v2503_v62 = vadd.s32 1, %v2341_v58 }
 0x191   : > { %v1247_v12 = vsel %vm1246_vm2, %v2023_v7, %v2024_v6  ;;  %v1248_v13 = vsel %vm1246_vm2, %v2024_v6, %v2023_v7  ;;  %v1380_v32 = vsel %vm704_vm7, %v2033_v10, %v2034_v9  ;;  %vm2469_vm12 = vmpackc.low %vm388_vm10, %vm388_vm10  ;;  %v392_v6 = vadd.s32 2, %v2344_v61 }
 0x192   : > { %v1254_v15 = vsel %vm374_vm15, %v1247_v12, 0.0  ;;  %v2414_v14 = vpop.permute.xlu0 %2036  ;;  %v2416_v17 = vpop.permute.xlu1 %2026  ;;  %1840 = vmatmul.mubr.msk.bf16.vlgmr.msra.gmra.mrb[0].mxu1 %vm759_vm3, %v2087_v4  ;;  %v1253_v18 = vsel %vm373_vm4, %v1248_v13, 0.0  ;;  %v1383_v41 = vsel %vm2348_vm6, %v1380_v32, 0.0  ;;  %v2092_v4 = vld [vmem:[%s2750_s3 + $0x18] sm:$0xff]   ;;  %vm387_vm14 = vcmp.lt.s32.totalorder %v2503_v62, 120  ;;  %v2098_v62 = vld [vmem:[%s2752_s5 + $0x20] sm:$0xff]  }
 0x193   : > { %v2039_v27 = vunpack.i.h.bf16 %v2414_v14  ;;  %v2038_v30 = vunpack.i.l.bf16 %v2414_v14  ;;  %v2029_v31 = vunpack.i.h.bf16 %v2416_v17  ;;  %v2028_v46 = vunpack.i.l.bf16 %v2416_v17  ;;  %878 = vmatpush1.bf16.msra.mxu1 %v2265_v42  ;;  %814 = vmatprep.mubr.bf16.mxu1 %v2113_v0  ;;  %vm2580_vm2 = vmpackc.low %vm387_vm14, %vm387_vm14 }
 0x194   : > { %879 = vmatprep.subr.bf16.mxu1 %v2273_v1  ;;  %v1256_v33 = vpack.c.bf16 %v1254_v15, %v1254_v15  ;;  %v1255_v35 = vpack.c.bf16 %v1253_v18, %v1253_v18  ;;  %v1239_v42 = vpack.c.bf16 %v2285_v36, %v2285_v36  ;;  %v2089_v1 = vld [vmem:[%s2750_s3 + $0x8] sm:$0xff]   ;;  %v1385_v48 = vpack.c.bf16 %v1383_v41, %v1383_v41 }
 0x195   : > { %v991_v36 = vsel %vm983_vm5, %v2039_v27, %v2029_v31  ;;  %v990_v43 = vsel %vm983_vm5, %v2038_v30, %v2028_v46  ;;  %vm396_vm15 = vcmp.lt.s32.totalorder %v392_v6, 120 }
 0x196   : > { %1897 = vmatprep.subr.msk.bf16.mxu0 %vm1266_vm9, %v1256_v33  ;;  %v2433_v37 = vpop.permute.xlu1 %2041  ;;  %v1268_v38 = vsel %vm1266_vm9, %v1255_v35, 0  ;;  %v2464_v34 = vpop.permute.xlu0 %2046  ;;  %v1865_v45 = vpack.c.bf16 %v991_v36, %v990_v43  ;;  %v985_v35 = vsel %vm983_vm5, %v2029_v31, %v2039_v27  ;;  %v2093_v43 = vld [vmem:[%s2752_s5 + $0x8] sm:$0xff]  }
 0x197   : > { %1274 = vmatpush1.bf16.msra.mxu0 %v1268_v38  ;;  %880 = vmatpush1.bf16.msra.mxu1 %v2271_v59  ;;  %v1325_v59 = vsel %vm1266_vm9, %v1238_v40, 0  ;;  %v2049_v13 = vunpack.i.h.bf16 %v2464_v34  ;;  %v2044_v61 = vunpack.i.h.bf16 %v2433_v37  ;;  %v2048_v32 = vunpack.i.l.bf16 %v2464_v34 }
 0x198   : > { %1900 = vmatprep.subr.msk.bf16.mxu0 %vm1266_vm9, %v1239_v42  ;;  %881 = vmatprep.subr.bf16.mxu1 %v2279_v29  ;;  %v1381_v29 = vsel %vm704_vm7, %v2034_v9, %v2033_v10  ;;  %v2043_v33 = vunpack.i.l.bf16 %v2433_v37  ;;  %v984_v37 = vsel %vm983_vm5, %v2028_v46, %v2038_v30 }
 0x199   : > { %v1382_v53 = vsel %vm2353_vm8, %v1381_v29, 0.0  ;;  %v993_v40 = vsel %vm983_vm5, %v2049_v13, %v2044_v61 }
 0x19a   : > { %1898 = vmatmul.mubr.msk.bf16.vlgmr.msra.gmra.mrb[24].mxu0 %vm1262_vm11, %v2088_v39  ;;  %v2474_v47 = vpop.permute.xlu1 %2051  ;;  %1841 = vmatmul.mubr.msk.bf16.gmra.mrb[4].mxu1 %vm759_vm3, %v2089_v1  ;;  %v2489_v51 = vpop.permute.xlu0 %2056  ;;  %v1384_v57 = vpack.c.bf16 %v1382_v53, %v1382_v53  ;;  %v391_v39 = vadd.s32 2, %v2341_v58  ;;  %v992_v17 = vsel %vm983_vm5, %v2048_v32, %v2043_v33  ;;  %v986_v29 = vsel %vm983_vm5, %v2043_v33, %v2048_v32 }
 0x19b   : > { %1331 = vmatpush1.bf16.msra.mxu0 %v1325_v59  ;;  %882 = vmatpush1.bf16.msra.mxu1 %v2277_v16  ;;  %v2059_v41 = vunpack.i.h.bf16 %v2489_v51  ;;  %v2054_v36 = vunpack.i.h.bf16 %v2474_v47  ;;  %v2058_v30 = vunpack.i.l.bf16 %v2489_v51  ;;  %v2053_v46 = vunpack.i.l.bf16 %v2474_v47 }
 0x19c   : > { %1905 = vmatprep.subr.msk.bf16.mxu0 %vm1266_vm9, %v1385_v48  ;;  %1866 = vmatprep.subr.msk.bf16.mxu1 %vm2469_vm12, %v1865_v45  ;;  %v1395_v3 = vsel %vm1266_vm9, %v1384_v57, 0  ;;  %v2094_v45 = vld [vmem:[%s2750_s3 + $0x20] sm:$0xff]   ;;  %v987_v48 = vsel %vm983_vm5, %v2044_v61, %v2049_v13  ;;  %v1868_v51 = vpack.c.bf16 %v985_v35, %v984_v37  ;;  %vm395_vm4 = vcmp.lt.s32.totalorder %v391_v39, 120  ;;  %v2095_v61 = vld [vmem:[%s2750_s3 + $0x28] sm:$0xff]  }
 0x19d   : > { %824 = vmatprep.mubr.bf16.mxu1 %v2113_v0  ;;  %1362 = vmatprep.mubr.bf16.mxu0 %v2113_v0  ;;  %v994_v53 = vsel %vm983_vm5, %v2058_v30, %v2053_v46  ;;  %v989_v57 = vsel %vm983_vm5, %v2054_v36, %v2059_v41 }
 0x19e   : > { %v2062_v49 = vpop.permute.xlu1 %2061  ;;  %v2067_v63 = vpop.permute.xlu0 %2066 }
 0x19f   : > { %v2064_v16 = vunpack.i.h.bf16 %v2062_v49  ;;  %v2063_v52 = vunpack.i.l.bf16 %v2062_v49  ;;  %v2069_v7 = vunpack.i.h.bf16 %v2067_v63  ;;  %v2068_v9 = vunpack.i.l.bf16 %v2067_v63 }
 0x1a1   : > { %v1455_v54 = vsel %vm983_vm5, %v2064_v16, %v2063_v52  ;;  %v1454_v10 = vsel %vm983_vm5, %v2063_v52, %v2064_v16  ;;  %v1530_v27 = vsel %vm1528_vm13, %v2069_v7, %v2068_v9  ;;  %v1871_v16 = vpack.c.bf16 %v993_v40, %v992_v17 }
 0x1a2   : > { %v1457_v55 = vsel %vm388_vm10, %v1455_v54, 0.0  ;;  %1842 = vmatmul.mubr.msk.bf16.gmra.mrb[8].mxu1 %vm759_vm3, %v2090_v50  ;;  %v2516_v12 = vpop.permute.xlu1 %2071  ;;  %v2532_v38 = vpop.permute.xlu0 %2076  ;;  %v1456_v42 = vsel %vm387_vm14, %v1454_v10, 0.0  ;;  %v1536_v59 = vsel %vm396_vm15, %v1530_v27, 0.0  ;;  %v995_v52 = vsel %vm983_vm5, %v2059_v41, %v2054_v36  ;;  %v2097_v41 = vld [vmem:[%s2750_s3 + $0x30] sm:$0xff]  }
 0x1a3   : > { %834 = vmatprep.mubr.bf16.mxu1 %v2113_v0  ;;  %v1459_v60 = vpack.c.bf16 %v1457_v55, %v1457_v55  ;;  %v2074_v15 = vunpack.i.h.bf16 %v2516_v12  ;;  %v2073_v18 = vunpack.i.l.bf16 %v2516_v12  ;;  %v2079_v31 = vunpack.i.h.bf16 %v2532_v38 }
 0x1a4   : > { %v2078_v1 = vunpack.i.l.bf16 %v2532_v38  ;;  %v1458_v34 = vpack.c.bf16 %v1456_v42, %v1456_v42  ;;  %v1529_v8 = vsel %vm1528_vm13, %v2068_v9, %v2069_v7  ;;  %v1538_v55 = vpack.c.bf16 %v1536_v59, %v1536_v59  ;;  %v2096_v38 = vld [vmem:[%s2752_s5 + $0x18] sm:$0xff]  }
 0x1a5   : > { %v1628_v14 = vsel %vm704_vm7, %v2073_v18, %v2074_v15  ;;  %v1877_v28 = vpack.c.bf16 %v995_v52, %v994_v53 }
 0x1a6   : > { %1901 = vmatmul.mubr.msk.bf16.vlgmr.msra.gmra.mrb[24].mxu0 %vm1262_vm11, %v2091_v56  ;;  %v1639_v47 = vsel %vm983_vm5, %v2079_v31, %v2078_v1  ;;  %v1631_v49 = vsel %vm2348_vm6, %v1628_v14, -inf  ;;  %v1469_v54 = vsel %vm1266_vm9, %v1458_v34, 0  ;;  %v1874_v56 = vpack.c.bf16 %v987_v48, %v986_v29  ;;  %v2099_v14 = vld [vmem:[%s2750_s3 + $0x38] sm:$0xff]   ;;  %v2103_v34 = vld [vmem:[%s2750_s3 + $0x50] sm:$0xff]  }
 0x1a7   : > { %1401 = vmatpush1.bf16.msra.mxu0 %v1395_v3  ;;  %1432 = vmatprep.mubr.bf16.mxu0 %v2113_v0  ;;  %v1633_v63 = vmax.f32 %v1631_v49, %v2199_v5  ;;  %v988_v5 = vsel %vm983_vm5, %v2053_v46, %v2058_v30  ;;  %v1638_v27 = vsel %vm983_vm5, %v2078_v1, %v2079_v31  ;;  %v2100_v30 = vld [vmem:[%s2754_s7] sm:$0xff]  }
 0x1a8   : > { %1910 = vmatprep.subr.msk.bf16.mxu0 %vm1266_vm9, %v1459_v60  ;;  %v1641_v60 = vsel %vm388_vm10, %v1639_v47, -inf  ;;  %v1880_v37 = vpack.c.bf16 %v989_v57, %v988_v5  ;;  %v1640_v31 = vsel %vm387_vm14, %v1638_v27, -inf  ;;  %v2101_v46 = vld [vmem:[%s2750_s3 + $0x40] sm:$0xff]  }
 0x1a9   : > { %v1643_v32 = vmax.f32 %v1633_v63, %v1641_v60 }
 0x1aa   : > { %1843 = vmatmul.mubr.msk.bf16.gmra.mrb[12].mxu1 %vm759_vm3, %v2092_v4 }
 0x1ab   : > { %909 = vmatprep.mubr.bf16.mxu1 %v2113_v0  ;;  %v1647_v58 = vpack.c.bf16 %v1643_v32, %v1643_v32 }
 0x1b2   : > { %1906 = vmatmul.mubr.msk.bf16.vlgmr.msra.gmra.mrb[24].mxu0 %vm1262_vm11, %v2093_v43  ;;  %1848 = vmatmul.mubr.msk.bf16.vlgmr.msra.gmra.mrb[0].mxu1 %vm759_vm3, %v2094_v45  ;;  %v2102_v43 = vld [vmem:[%s2750_s3 + $0x48] sm:$0xff]   ;;  %v2104_v45 = vld [vmem:[%s2750_s3 + $0x58] sm:$0xff]  }
 0x1b3   : > { %1475 = vmatpush1.bf16.msra.mxu0 %v1469_v54  ;;  %1869 = vmatpush1.bf16.msk.msra.mxu1 %vm2580_vm2, %v1868_v51  ;;  %v434_v3 = vpop.permute.xlu0 %433  ;;  %v429_v4 = vpop.permute.xlu1 %428 }
 0x1b4   : > { %1915 = vmatprep.subr.msk.bf16.mxu0 %vm1266_vm9, %v1538_v55  ;;  %v574_v6 = vadd.f32 %v2253_v21, %v434_v3  ;;  %v576_v7 = vadd.f32 %v2255_v22, %v434_v3  ;;  %v570_v9 = vadd.f32 %v2249_v19, %v429_v4  ;;  %v572_v10 = vadd.f32 %v2251_v20, %v429_v4 }
 0x1b5   : > { %v1629_v21 = vsel %vm704_vm7, %v2074_v15, %v2073_v18  ;;  %1872 = vmatprep.subr.msk.bf16.mxu1 %vm2469_vm12, %v1871_v16  ;;  %919 = vmatprep.mubr.bf16.mxu1 %v2113_v0  ;;  %v1535_v19 = vsel %vm395_vm4, %v1529_v8, 0.0 }
 0x1b6   : > { %v628_v20 = vmax.f32 %v574_v6, 0.0  ;;  %v629_v22 = vmax.f32 %v576_v7, 0.0  ;;  %v626_v12 = vmax.f32 %v570_v9, 0.0  ;;  %v627_v13 = vmax.f32 %v572_v10, 0.0  ;;  %1506 = vmatprep.mubr.bf16.mxu0 %v2113_v0 }
 0x1b7   : > { %1875 = vmatpush1.bf16.msk.msra.mxu1 %vm2580_vm2, %v1874_v56  ;;  %v444_v15 = vpop.permute.xlu0 %443  ;;  %v439_v18 = vpop.permute.xlu1 %438 }
 0x1b8   : > { %649 = vst [vmem:[%s2609_s20 + $0x8] sm:$0xff] %v628_v20  ;;  %648 = vst [vmem:[%s2609_s20] sm:$0xff] %v626_v12  ;;  %v584_v33 = vadd.f32 %v2261_v25, %v444_v15  ;;  %v586_v35 = vadd.f32 %v2263_v26, %v444_v15  ;;  %v580_v42 = vadd.f32 %v2257_v23, %v439_v18  ;;  %1878 = vmatprep.subr.msk.bf16.mxu1 %vm2469_vm12, %v1877_v28 }
 0x1b9   : > { %v582_v39 = vadd.f32 %v2259_v24, %v439_v18  ;;  %v1630_v25 = vsel %vm2353_vm8, %v1629_v21, -inf  ;;  %1807 = vst [vmem:[%s2609_s20 + $0x88] sm:$0xff] %v629_v22  ;;  %1806 = vst [vmem:[%s2609_s20 + $0x80] sm:$0xff] %v627_v13  ;;  %v1537_v23 = vpack.c.bf16 %v1535_v19, %v1535_v19 }
 0x1ba   : > { %v632_v24 = vmax.f32 %v584_v33, 0.0  ;;  %v633_v26 = vmax.f32 %v586_v35, 0.0  ;;  %v630_v44 = vmax.f32 %v580_v42, 0.0  ;;  %1849 = vmatmul.mubr.msk.bf16.gmra.mrb[4].mxu1 %vm759_vm3, %v2095_v61  ;;  %v1632_v11 = vmax.f32 %v1630_v25, %v2189_v2 }
 0x1bb   : > { %v631_v40 = vmax.f32 %v582_v39, 0.0  ;;  %1881 = vmatpush1.bf16.msk.msra.mxu1 %vm2580_vm2, %v1880_v37  ;;  %929 = vmatprep.mubr.bf16.mxu1 %v2113_v0  ;;  %v1548_v1 = vsel %vm1266_vm9, %v1537_v23, 0  ;;  %v1150_v59 = vpop.permute.xlu1 %1149  ;;  %v1155_v48 = vpop.permute.xlu0 %1154 }
 0x1bc   : > { %651 = vst [vmem:[%s2609_s20 + $0x18] sm:$0xff] %v632_v24  ;;  %650 = vst [vmem:[%s2609_s20 + $0x10] sm:$0xff] %v630_v44  ;;  %v1642_v36 = vmax.f32 %v1632_v11, %v1640_v31 }
 0x1bd   : > { %1809 = vst [vmem:[%s2609_s20 + $0x98] sm:$0xff] %v633_v26  ;;  %1808 = vst [vmem:[%s2609_s20 + $0x90] sm:$0xff] %v631_v40 }
 0x1be   : > { %1911 = vmatmul.mubr.msk.bf16.vlgmr.msra.gmra.mrb[24].mxu0 %vm1262_vm11, %v2096_v38  ;;  %v1646_v2 = vpack.c.bf16 %v1642_v36, %v1642_v36 }
 0x1bf   : > { %1554 = vmatpush1.bf16.msra.mxu0 %v1548_v1  ;;  %1585 = vmatprep.mubr.bf16.mxu0 %v2113_v0  ;;  %v1160_v29 = vpop.permute.xlu1 %1159  ;;  %v2700_v47 = vpop.permute.xlu0 %1164 }
 0x1c0   : > { %1920 = vmatprep.subr.msk.bf16.mxu0 %vm528_vm0, %v1647_v58  ;;  %v1669_v17 = vsel %vm528_vm0, %v1646_v2, 0 }
 0x1c2   : > { %1850 = vmatmul.mubr.msk.bf16.gmra.mrb[8].mxu1 %vm759_vm3, %v2097_v41 }
 0x1c3   : > { %939 = vmatprep.mubr.bf16.mxu1 %v2113_v0  ;;  %v2702_v49 = vpop.permute.xlu1 %1169  ;;  %v2704_v50 = vpop.permute.xlu0 %1174 }
 0x1c7   : > { %v2706_v51 = vpop.permute.xlu1 %1179 }
 0x1ca   : > { %1916 = vmatmul.mubr.msk.bf16.vlgmr.msra.gmra.mrb[24].mxu0 %vm1262_vm11, %v2098_v62  ;;  %1851 = vmatmul.mubr.msk.bf16.gmra.mrb[12].mxu1 %vm759_vm3, %v2099_v14 }
 0x1cb   : > { %1675 = vmatpush1.bf16.msra.mxu0 %v1669_v17  ;;  %1706 = vmatprep.mubr.bf16.mxu0 %v2113_v0  ;;  %v1605_v16 = vpop.permute.xlu1 %1604 }
 0x1cc   : > { %1082 = vmatprep.mubr.bf16.mxu1 %v2113_v0 }
 0x1cf   : > { %v1653_v10 = vpop.permute.xlu1 %1652 }
 0x1d2   : > { %1921 = vmatmul.mubr.msk.bf16.vlgmr.msra.gmra.mrb[28].mxu0 %vm509_vm1, %v2100_v30  ;;  %1882 = vmatmul.mubr.msk.bf16.vlgmr.msra.gmra.mrb[0].mxu1 %vm759_vm3, %v2101_v46 }
 0x1d3   : > { %1092 = vmatprep.mubr.bf16.mxu1 %v2113_v0 }
 0x1da   : > { %1883 = vmatmul.mubr.msk.bf16.gmra.mrb[4].mxu1 %vm759_vm3, %v2102_v43 }
 0x1db   : > { %1102 = vmatprep.mubr.bf16.mxu1 %v2113_v0 }
 0x1e2   : > { %1884 = vmatmul.mubr.msk.bf16.gmra.mrb[8].mxu1 %vm759_vm3, %v2103_v34 }
 0x1e3   : > { %1112 = vmatprep.mubr.bf16.mxu1 %v2113_v0  ;;  %v2708_v0 = vpop.permute.xlu0 %1184 }
 0x1e7   : > { %v1610_v53 = vpop.permute.xlu0 %1609 }
 0x1ea   : > { %1885 = vmatmul.mubr.msk.bf16.gmra.mrb[12].mxu1 %vm759_vm3, %v2104_v45 }
 0x1eb   : > { %v1658_v9 = vpop.permute.xlu0 %1657 }
 0x29d   : > { %v1587_v52 = vpop.f32.mrb[24].mxu0 }
 0x29e   : > { %v1612_v8 = vadd.f32 %v1605_v16, %v1587_v52  ;;  %v1589_v54 = vpop.f32.mrb[25].mxu0 }
 0x29f   : > { %v1613_v55 = vadd.f32 %v1605_v16, %v1589_v54  ;;  %v1591_v56 = vpop.f32.mrb[26].mxu0 }
 0x2a0   : > { %v1616_v57 = vmax.f32 %v1612_v8, 0.0  ;;  %v1614_v60 = vadd.f32 %v1610_v53, %v1591_v56  ;;  %v1593_v63 = vpop.f32.mrb[27].mxu0 }
 0x2a1   : > { %v1617_v3 = vmax.f32 %v1613_v55, 0.0  ;;  %v1615_v4 = vadd.f32 %v1610_v53, %v1593_v63 }
 0x2a2   : > { %1620 = vst [vmem:[%s2609_s20 + $0x60] sm:$0xff] %v1616_v57  ;;  %v1618_v6 = vmax.f32 %v1614_v60, 0.0 }
 0x2a3   : > { %1917 = vst [vmem:[%s2609_s20 + $0xe0] sm:$0xff] %v1617_v3  ;;  %v1619_v7 = vmax.f32 %v1615_v4, 0.0 }
 0x2a4   : > { %1621 = vst [vmem:[%s2609_s20 + $0x68] sm:$0xff] %v1618_v6 }
 0x2a5   : > { %1918 = vst [vmem:[%s2609_s20 + $0xe8] sm:$0xff] %v1619_v7  ;;  %v1708_v5 = vpop.f32.mrb[28].mxu0  ;;  %v1084_v28 = vpop.f32.mrb[0].mxu1 }
 0x2a6   : > { %v1709_v21 = vadd.f32 %v1708_v5, %v1653_v10  ;;  %v1187_v19 = vadd.f32 %v1150_v59, %v1084_v28  ;;  %v1710_v20 = vpop.f32.mrb[29].mxu0  ;;  %v1086_v22 = vpop.f32.mrb[1].mxu1 }
 0x2a7   : > { %v1711_v12 = vadd.f32 %v1710_v20, %v1653_v10  ;;  %v1188_v13 = vadd.f32 %v1150_v59, %v1086_v22  ;;  %v1712_v61 = vpop.f32.mrb[30].mxu0  ;;  %v1088_v15 = vpop.f32.mrb[2].mxu1 }
 0x2a8   : > { %v1717_v18 = vmax.f32 %v1709_v21, 0.0  ;;  %v1203_v32 = vmax.f32 %v1187_v19, 0.0  ;;  %v1713_v33 = vadd.f32 %v1712_v61, %v1658_v9  ;;  %v1189_v35 = vadd.f32 %v1155_v48, %v1088_v15  ;;  %v1714_v42 = vpop.f32.mrb[31].mxu0  ;;  %v1090_v39 = vpop.f32.mrb[3].mxu1 }
 0x2a9   : > { %v1718_v37 = vmax.f32 %v1711_v12, 0.0  ;;  %v1204_v27 = vmax.f32 %v1188_v13, 0.0  ;;  %v1715_v25 = vadd.f32 %v1714_v42, %v1658_v9  ;;  %v1190_v23 = vadd.f32 %v1155_v48, %v1090_v39 }
 0x2aa   : > { %1721 = vst [vmem:[%s2609_s20 + $0x70] sm:$0xff] %v1717_v18  ;;  %1219 = vst [vmem:[%s2609_s20 + $0x20] sm:$0xff] %v1203_v32  ;;  %v1719_v24 = vmax.f32 %v1713_v33, 0.0  ;;  %v1205_v26 = vmax.f32 %v1189_v35, 0.0 }
 0x2ab   : > { %1922 = vst [vmem:[%s2609_s20 + $0xf0] sm:$0xff] %v1718_v37  ;;  %1886 = vst [vmem:[%s2609_s20 + $0xa0] sm:$0xff] %v1204_v27  ;;  %v1720_v44 = vmax.f32 %v1715_v25, 0.0  ;;  %v1206_v40 = vmax.f32 %v1190_v23, 0.0 }
 0x2ac   : > { %1722 = vst [vmem:[%s2609_s20 + $0x78] sm:$0xff] %v1719_v24  ;;  %1220 = vst [vmem:[%s2609_s20 + $0x28] sm:$0xff] %v1205_v26 }
 0x2ad   : > { %1923 = vst [vmem:[%s2609_s20 + $0xf8] sm:$0xff] %v1720_v44  ;;  %1887 = vst [vmem:[%s2609_s20 + $0xa8] sm:$0xff] %v1206_v40  ;;  %v1094_v38 = vpop.f32.mrb[4].mxu1 }
 0x2ae   : > { %v1191_v58 = vadd.f32 %v1160_v29, %v1094_v38  ;;  %v1096_v11 = vpop.f32.mrb[5].mxu1 }
 0x2af   : > { %v1192_v31 = vadd.f32 %v1160_v29, %v1096_v11  ;;  %v1098_v1 = vpop.f32.mrb[6].mxu1 }
 0x2b0   : > { %v1207_v41 = vmax.f32 %v1191_v58, 0.0  ;;  %v1193_v36 = vadd.f32 %v2700_v47, %v1098_v1  ;;  %v1100_v2 = vpop.f32.mrb[7].mxu1 }
 0x2b1   : > { %v1208_v62 = vmax.f32 %v1192_v31, 0.0  ;;  %v1194_v14 = vadd.f32 %v2700_v47, %v1100_v2 }
 0x2b2   : > { %1221 = vst [vmem:[%s2609_s20 + $0x30] sm:$0xff] %v1207_v41  ;;  %v1209_v17 = vmax.f32 %v1193_v36, 0.0 }
 0x2b3   : > { %1888 = vst [vmem:[%s2609_s20 + $0xb0] sm:$0xff] %v1208_v62  ;;  %v1210_v30 = vmax.f32 %v1194_v14, 0.0 }
 0x2b4   : > { %1222 = vst [vmem:[%s2609_s20 + $0x38] sm:$0xff] %v1209_v17 }
 0x2b5   : > { %1889 = vst [vmem:[%s2609_s20 + $0xb8] sm:$0xff] %v1210_v30  ;;  %v1104_v46 = vpop.f32.mrb[8].mxu1 }
 0x2b6   : > { %v1195_v43 = vadd.f32 %v2702_v49, %v1104_v46  ;;  %v1106_v34 = vpop.f32.mrb[9].mxu1 }
 0x2b7   : > { %v1196_v45 = vadd.f32 %v2702_v49, %v1106_v34  ;;  %v1108_v59 = vpop.f32.mrb[10].mxu1 }
 0x2b8   : > { %v1211_v48 = vmax.f32 %v1195_v43, 0.0  ;;  %v1197_v29 = vadd.f32 %v2704_v50, %v1108_v59  ;;  %v1110_v47 = vpop.f32.mrb[11].mxu1 }
 0x2b9   : > { %v1212_v16 = vmax.f32 %v1196_v45, 0.0  ;;  %v1198_v52 = vadd.f32 %v2704_v50, %v1110_v47 }
 0x2ba   : > { %1223 = vst [vmem:[%s2609_s20 + $0x40] sm:$0xff] %v1211_v48  ;;  %v1213_v53 = vmax.f32 %v1197_v29, 0.0 }
 0x2bb   : > { %1890 = vst [vmem:[%s2609_s20 + $0xc0] sm:$0xff] %v1212_v16  ;;  %v1214_v8 = vmax.f32 %v1198_v52, 0.0 }
 0x2bc   : > { %1224 = vst [vmem:[%s2609_s20 + $0x48] sm:$0xff] %v1213_v53 }
 0x2bd   : > { %1891 = vst [vmem:[%s2609_s20 + $0xc8] sm:$0xff] %v1214_v8  ;;  %v1114_v54 = vpop.f32.mrb[12].mxu1 }
 0x2be   : > { %v1199_v49 = vadd.f32 %v2706_v51, %v1114_v54  ;;  %v1116_v55 = vpop.f32.mrb[13].mxu1 }
 0x2bf   : > { %v1200_v56 = vadd.f32 %v2706_v51, %v1116_v55  ;;  %v1118_v57 = vpop.f32.mrb[14].mxu1 }
 0x2c0   : > { %v1215_v60 = vmax.f32 %v1199_v49, 0.0  ;;  %v1201_v50 = vadd.f32 %v2708_v0, %v1118_v57  ;;  %v1120_v63 = vpop.f32.mrb[15].mxu1 }
 0x2c1   : > { %v1216_v3 = vmax.f32 %v1200_v56, 0.0  ;;  %v1202_v4 = vadd.f32 %v2708_v0, %v1120_v63 }
 0x2c2   : > { %1225 = vst [vmem:[%s2609_s20 + $0x50] sm:$0xff] %v1215_v60  ;;  %v1217_v6 = vmax.f32 %v1201_v50, 0.0 }
 0x2c3   : > { %1892 = vst [vmem:[%s2609_s20 + $0xd0] sm:$0xff] %v1216_v3  ;;  %v1218_v7 = vmax.f32 %v1202_v4, 0.0 }
 0x2c4   : > { %1226 = vst [vmem:[%s2609_s20 + $0x58] sm:$0xff] %v1217_v6 }
 0x2c5   : > { %1893 = vst [vmem:[%s2609_s20 + $0xd8] sm:$0xff] %v1218_v7 }
 0x2c6 PF: > { %s19_s30 = sadd.s32 1, %s2111_s30  }
 0x2c7   : > { %p16_p4 = scmp.ge.s32.totalorder %s19_s30, 4  }
 0x2c9   :  { %18 = sbr.rel (!%p16_p4) target bundleno = 1 (0x1), region = 93 }

</bundles_post_ra>
